<compile_context>
chip_gen: v6e
topology: v6e:2x2x1
jax: 0.10.0
libtpu: 0.0.40
codegen_flags: <defaults>
</compile_context>

<pallas_src>
import functools

import numpy as np

import jax
import jax.numpy as jnp
from jax.experimental import pallas as pl
from jax.experimental.pallas import tpu as pltpu


# ----------------------------------------------------------------------------
# Fused kernel: conv1 -> conv2 -> conv3 -> fc -> out -> argmax (all in VMEM)
# ----------------------------------------------------------------------------
def _fused_net_kernel(cols1_ref, w1_ref, b1_ref,
                      s2_ref, w2_ref, b2_ref,
                      s3_ref, w3_ref, b3_ref,
                      wfc_ref, bfc_ref, wo_ref, bo_ref,
                      out_ref):
    f32 = jnp.float32

    def conv_offsets(h, s_ref, w_ref, b_ref):
        # Conv(3x3, stride 2) as a sum of 9 offset GEMMs:
        #   y = tanh( b + sum_q  S_q @ h @ W_q )
        # S_q : (rows_out, rows_in) constant 0/1 gather (block-diag over batch tile)
        # W_q : (C_in, C_out) slice of the conv weight at kernel offset q.
        acc = None
        for q in range(9):                                  # static unroll
            g = jnp.dot(s_ref[q], h, preferred_element_type=f32)
            t = jnp.dot(g, w_ref[q], preferred_element_type=f32)
            acc = t if acc is None else acc + t
        return jnp.tanh(acc + b_ref[...])

    # layer1 + act1 (im2col GEMM; 1/255 already folded into w1)
    h = jnp.tanh(jnp.dot(cols1_ref[0], w1_ref[...],
                         preferred_element_type=f32) + b1_ref[...])   # (tb*49, CC)
    # layer2 + act2
    h = conv_offsets(h, s2_ref, w2_ref, b2_ref)                       # (tb*9, CC)
    # layer2_bis + act2_bis  (final spatial size is 1x1 -> already "flattened")
    h = conv_offsets(h, s3_ref, w3_ref, b3_ref)                       # (tb, CC)
    # layer3 + act3
    h = jnp.tanh(jnp.dot(h, wfc_ref[...],
                         preferred_element_type=f32) + bfc_ref[...])  # (tb, channels)
    # out_layer + argmax (Discrete head, inference path)
    logits = jnp.dot(h, wo_ref[...],
                     preferred_element_type=f32) + bo_ref[...]        # (tb, n_act)
    n = logits.shape[1]
    ids = jax.lax.broadcasted_iota(jnp.int32, logits.shape, 1)
    maxv = jnp.max(logits, axis=1, keepdims=True)
    idx = jnp.min(jnp.where(logits == maxv, ids, n), axis=1, keepdims=True)
    out_ref[0] = idx.astype(jnp.int32)                                # (tb, 1)


# ----------------------------------------------------------------------------
# One-time host-side prep (hoisted out of the hot path)
# ----------------------------------------------------------------------------
def _conv_out(n):
    return (n - 3) // 2 + 1


def _build_gather(tb, ih, iw, oh, ow, stride=2):
    """0/1 selection matrices S[q] (q = di*3+dj), block-diagonal over batch tile."""
    S = np.zeros((9, tb * oh * ow, tb * ih * iw), np.float32)
    for di in range(3):
        for dj in range(3):
            q = di * 3 + dj
            for b in range(tb):
                for i in range(oh):
                    for j in range(ow):
                        r = b * oh * ow + i * ow + j
                        c = b * ih * iw + (stride * i + di) * iw + (stride * j + dj)
                        S[q, r, c] = 1.0
    return jnp.asarray(S)


def init_params(key, in_c, conv_channels, channels, output_size, input_hw):
    """Matches the PyTorch __init__ (normal_ std=1/2, zeros_ biases), torch layout."""
    H, W = input_hw
    flat = _conv_out(_conv_out(_conv_out(H))) * _conv_out(_conv_out(_conv_out(W))) \
        * conv_channels
    ks = jax.random.split(key, 5)
    return {
        "w1": jax.random.normal(ks[0], (conv_channels, in_c, 3, 3), jnp.float32),
        "b1": jnp.zeros((conv_channels,), jnp.float32),
        "w2": jax.random.normal(ks[1], (conv_channels, conv_channels, 3, 3), jnp.float32),
        "b2": jnp.zeros((conv_channels,), jnp.float32),
        "w2b": jax.random.normal(ks[2], (conv_channels, conv_channels, 3, 3), jnp.float32),
        "b2b": jnp.zeros((conv_channels,), jnp.float32),
        "w3": jax.random.normal(ks[3], (channels, flat), jnp.float32) * 2.0,
        "b3": jnp.zeros((channels,), jnp.float32),
        "wo": jax.random.normal(ks[4], (output_size, channels), jnp.float32) * 2.0,
        "bo": jnp.zeros((output_size,), jnp.float32),
    }


def prepare_params(raw, *, input_hw, batch, rescale=True):
    """Pre-transpose weights, fold 1/255 into w1, build gather matrices. Run once."""
    H, W = input_hw
    OH1, OW1 = _conv_out(H), _conv_out(W)
    OH2, OW2 = _conv_out(OH1), _conv_out(OW1)
    OH3, OW3 = _conv_out(OH2), _conv_out(OW2)
    if OH3 * OW3 != 1:
        # TODO(synk): general flatten order (c, oh, ow) for >1x1 conv3 output would be
        # folded into wfc as a column permutation; only the 16x16 case is needed here.
        raise NotImplementedError("conv stack must reduce spatial size to 1x1")

    cc, cin = raw["w1"].shape[0], raw["w1"].shape[1]
    tb = min(batch, 8)                       # batch tile -> bounded VMEM, v7x megacore
    scale = (1.0 / 255.0) if rescale else 1.0

    prep = {
        # conv1 as im2col GEMM, rescale folded in: columns ordered (c, di, dj)
        "w1": (raw["w1"].reshape(cc, cin * 9).T * scale).astype(jnp.float32),
        "b1": raw["b1"].reshape(1, cc),
        # conv2 / conv3 as 9 offset GEMMs: W_q = w[:, :, di, dj].T, q = di*3+dj
        "s2": _build_gather(tb, OH1, OW1, OH2, OW2),
        "w2": jnp.transpose(raw["w2"], (2, 3, 1, 0)).reshape(9, cc, cc),
        "b2": raw["b2"].reshape(1, cc),
        "s3": _build_gather(tb, OH2, OW2, OH3, OW3),
        "w3": jnp.transpose(raw["w2b"], (2, 3, 1, 0)).reshape(9, cc, cc),
        "b3": raw["b2b"].reshape(1, cc),
        # dense layers, pre-transposed to (in, out)
        "wfc": raw["w3"].T,
        "bfc": raw["b3"].reshape(1, -1),
        "wo": raw["wo"].T,
        "bo": raw["bo"].reshape(1, -1),
    }
    return prep, tb


# ----------------------------------------------------------------------------
# Input prep (one-time im2col of the raw input, plain XLA) + fused forward
# ----------------------------------------------------------------------------
def _im2col_3x3_s2(x):
    """x: (B, C, H, W) NCHW -> (B, OH*OW, C*9), column order (c, di, dj)."""
    B, C, H, W = x.shape
    OH, OW = _conv_out(H), _conv_out(W)
    patches = [x[:, :, i:i + 2 * OH:2, j:j + 2 * OW:2]
               for i in range(3) for j in range(3)]
    p = jnp.stack(patches, axis=2)            # (B, C, 9, OH, OW)
    p = p.transpose(0, 3, 4, 1, 2)            # (B, OH, OW, C, 9)
    return p.reshape(B, OH * OW, C * 9), OH, OW


def _full_spec(a):
    nd = a.ndim
    return pl.BlockSpec(a.shape, lambda i, _nd=nd: (0,) * _nd)


def net_forward(x, prep, *, tb):
    B = x.shape[0]
    cols1, OH1, OW1 = _im2col_3x3_s2(x)       # (B, P1, K1)
    P1, K1 = OH1 * OW1, cols1.shape[-1]

    Bp = ((B + tb - 1) // tb) * tb            # pad batch to a multiple of the tile
    if Bp != B:
        cols1 = jnp.pad(cols1, ((0, Bp - B), (0, 0), (0, 0)))
    nb = Bp // tb
    cols1 = cols1.reshape(nb, tb * P1, K1)    # leading grid dim; last 2 dims = full

    weights = (prep["w1"], prep["b1"],
               prep["s2"], prep["w2"], prep["b2"],
               prep["s3"], prep["w3"], prep["b3"],
               prep["wfc"], prep["bfc"], prep["wo"], prep["bo"])

    grid_spec = pltpu.PrefetchScalarGridSpec(
        num_scalar_prefetch=0,
        grid=(nb,),
        in_specs=[pl.BlockSpec((1, tb * P1, K1), lambda i: (i, 0, 0))]
                + [_full_spec(a) for a in weights],
        out_specs=pl.BlockSpec((1, tb, 1), lambda i: (i, 0, 0)),
    )

    out = pl.pallas_call(
        _fused_net_kernel,
        out_shape=jax.ShapeDtypeStruct((nb, tb, 1), jnp.int32),
        grid_spec=grid_spec,
        compiler_params=pltpu.CompilerParams(
            dimension_semantics=("parallel",)),   # batch tiles shard across TCs (v7x)
    )(cols1, *weights)

    return out.reshape(Bp)[:B]


# TODO(synk): the vector-observation (Box obs) branch and the Box-action head
# (sigmoid + out_bounds rescale), plus the train=True raw-logit path, are not
# implemented; they would reuse the same fused dense pattern.

if __name__ == "__main__":
    key = jax.random.PRNGKey(0)
    k_x, k_p = jax.random.split(key)

    B, C, H, W = 2, 3, 16, 16        # gym image Box (16,16,3) -> NCHW (3,16,16)
    conv_channels = 8
    channels = 32
    output_size = 4                  # Discrete(4)

    x = jax.random.uniform(k_x, (B, C, H, W), jnp.float32, 0.0, 255.0)
    raw_params = init_params(k_p, C, conv_channels, channels, output_size, (H, W))
    prep, tb = prepare_params(raw_params, input_hw=(H, W), batch=B, rescale=True)

    fwd = jax.jit(functools.partial(net_forward, tb=tb))
    actions = fwd(x, prep)
    jax.block_until_ready(actions)

    assert actions.shape == (B,) and actions.dtype == jnp.int32
    print("KERNEL_OK")
</pallas_src>

<mosaic_0001>
module attributes {stable_mosaic.version = 11 : i64} {
  func.func @_fused_net_kernel(%arg0: i32, %arg1: memref<1x98x27xf32, #tpu.memory_space<vmem>>, %arg2: memref<27x8xf32, #tpu.memory_space<vmem>>, %arg3: memref<1x8xf32, #tpu.memory_space<vmem>>, %arg4: memref<9x18x98xf32, #tpu.memory_space<vmem>>, %arg5: memref<9x8x8xf32, #tpu.memory_space<vmem>>, %arg6: memref<1x8xf32, #tpu.memory_space<vmem>>, %arg7: memref<9x2x18xf32, #tpu.memory_space<vmem>>, %arg8: memref<9x8x8xf32, #tpu.memory_space<vmem>>, %arg9: memref<1x8xf32, #tpu.memory_space<vmem>>, %arg10: memref<8x32xf32, #tpu.memory_space<vmem>>, %arg11: memref<1x32xf32, #tpu.memory_space<vmem>>, %arg12: memref<32x4xf32, #tpu.memory_space<vmem>>, %arg13: memref<1x4xf32, #tpu.memory_space<vmem>>, %arg14: memref<1x2x1xi32, #tpu.memory_space<vmem>>) attributes {dimension_semantics = [#tpu.dimension_semantics<parallel>], iteration_bounds = array<i64: 1>, scalar_prefetch = 0 : i64, scratch_operands = 0 : i64, tpu.core_type = #tpu.core_type<tc>, window_params = [{transform_indices = @transform_0, window_bounds = array<i64: 1, 98, 27>}, {pipeline_mode = #tpu.pipeline_mode<synchronous>, transform_indices = @transform_1, window_bounds = array<i64: 27, 8>}, {pipeline_mode = #tpu.pipeline_mode<synchronous>, transform_indices = @transform_2, window_bounds = array<i64: 1, 8>}, {pipeline_mode = #tpu.pipeline_mode<synchronous>, transform_indices = @transform_3, window_bounds = array<i64: 9, 18, 98>}, {pipeline_mode = #tpu.pipeline_mode<synchronous>, transform_indices = @transform_4, window_bounds = array<i64: 9, 8, 8>}, {pipeline_mode = #tpu.pipeline_mode<synchronous>, transform_indices = @transform_5, window_bounds = array<i64: 1, 8>}, {pipeline_mode = #tpu.pipeline_mode<synchronous>, transform_indices = @transform_6, window_bounds = array<i64: 9, 2, 18>}, {pipeline_mode = #tpu.pipeline_mode<synchronous>, transform_indices = @transform_7, window_bounds = array<i64: 9, 8, 8>}, {pipeline_mode = #tpu.pipeline_mode<synchronous>, transform_indices = @transform_8, window_bounds = array<i64: 1, 8>}, {pipeline_mode = #tpu.pipeline_mode<synchronous>, transform_indices = @transform_9, window_bounds = array<i64: 8, 32>}, {pipeline_mode = #tpu.pipeline_mode<synchronous>, transform_indices = @transform_10, window_bounds = array<i64: 1, 32>}, {pipeline_mode = #tpu.pipeline_mode<synchronous>, transform_indices = @transform_11, window_bounds = array<i64: 32, 4>}, {pipeline_mode = #tpu.pipeline_mode<synchronous>, transform_indices = @transform_12, window_bounds = array<i64: 1, 4>}, {transform_indices = @transform_13, window_bounds = array<i64: 1, 2, 1>}]} {
    %c0 = arith.constant 0 : index
    %c0_0 = arith.constant 0 : index
    %c0_1 = arith.constant 0 : index
    %0 = vector.load %arg1[%c0, %c0_0, %c0_1] : memref<1x98x27xf32, #tpu.memory_space<vmem>>, vector<1x98x27xf32>
    %1 = vector.shape_cast %0 : vector<1x98x27xf32> to vector<98x27xf32>
    %c0_2 = arith.constant 0 : index
    %c0_3 = arith.constant 0 : index
    %2 = vector.load %arg2[%c0_2, %c0_3] : memref<27x8xf32, #tpu.memory_space<vmem>>, vector<27x8xf32>
    %cst = arith.constant dense<0.000000e+00> : vector<98x8xf32>
    %3 = tpu.matmul %1, %2, %cst {dimension_numbers = #tpu.dot_dimension_numbers<[1], [0], [0], [1], [0, 0, 1, 1], [], []>} : vector<98x27xf32>, vector<27x8xf32>, vector<98x8xf32> -> vector<98x8xf32>
    %c0_4 = arith.constant 0 : index
    %c0_5 = arith.constant 0 : index
    %4 = vector.load %arg3[%c0_4, %c0_5] : memref<1x8xf32, #tpu.memory_space<vmem>>, vector<1x8xf32>
    %5 = vector.broadcast %4 : vector<1x8xf32> to vector<98x8xf32>
    %6 = arith.addf %3, %5 : vector<98x8xf32>
    %7 = math.tanh %6 : vector<98x8xf32>
    %c0_6 = arith.constant 0 : index
    %c0_7 = arith.constant 0 : index
    %c0_8 = arith.constant 0 : index
    %8 = vector.load %arg4[%c0_6, %c0_7, %c0_8] : memref<9x18x98xf32, #tpu.memory_space<vmem>>, vector<1x18x98xf32>
    %9 = vector.shape_cast %8 : vector<1x18x98xf32> to vector<18x98xf32>
    %cst_9 = arith.constant dense<0.000000e+00> : vector<18x8xf32>
    %10 = tpu.matmul %9, %7, %cst_9 {dimension_numbers = #tpu.dot_dimension_numbers<[1], [0], [0], [1], [0, 0, 1, 1], [], []>} : vector<18x98xf32>, vector<98x8xf32>, vector<18x8xf32> -> vector<18x8xf32>
    %c0_10 = arith.constant 0 : index
    %c0_11 = arith.constant 0 : index
    %c0_12 = arith.constant 0 : index
    %11 = vector.load %arg5[%c0_10, %c0_11, %c0_12] : memref<9x8x8xf32, #tpu.memory_space<vmem>>, vector<1x8x8xf32>
    %12 = vector.shape_cast %11 : vector<1x8x8xf32> to vector<8x8xf32>
    %cst_13 = arith.constant dense<0.000000e+00> : vector<18x8xf32>
    %13 = tpu.matmul %10, %12, %cst_13 {dimension_numbers = #tpu.dot_dimension_numbers<[1], [0], [0], [1], [0, 0, 1, 1], [], []>} : vector<18x8xf32>, vector<8x8xf32>, vector<18x8xf32> -> vector<18x8xf32>
    %c1 = arith.constant 1 : index
    %c0_14 = arith.constant 0 : index
    %c0_15 = arith.constant 0 : index
    %14 = vector.load %arg4[%c1, %c0_14, %c0_15] : memref<9x18x98xf32, #tpu.memory_space<vmem>>, vector<1x18x98xf32>
    %15 = vector.shape_cast %14 : vector<1x18x98xf32> to vector<18x98xf32>
    %cst_16 = arith.constant dense<0.000000e+00> : vector<18x8xf32>
    %16 = tpu.matmul %15, %7, %cst_16 {dimension_numbers = #tpu.dot_dimension_numbers<[1], [0], [0], [1], [0, 0, 1, 1], [], []>} : vector<18x98xf32>, vector<98x8xf32>, vector<18x8xf32> -> vector<18x8xf32>
    %c1_17 = arith.constant 1 : index
    %c0_18 = arith.constant 0 : index
    %c0_19 = arith.constant 0 : index
    %17 = vector.load %arg5[%c1_17, %c0_18, %c0_19] : memref<9x8x8xf32, #tpu.memory_space<vmem>>, vector<1x8x8xf32>
    %18 = vector.shape_cast %17 : vector<1x8x8xf32> to vector<8x8xf32>
    %cst_20 = arith.constant dense<0.000000e+00> : vector<18x8xf32>
    %19 = tpu.matmul %16, %18, %cst_20 {dimension_numbers = #tpu.dot_dimension_numbers<[1], [0], [0], [1], [0, 0, 1, 1], [], []>} : vector<18x8xf32>, vector<8x8xf32>, vector<18x8xf32> -> vector<18x8xf32>
    %20 = arith.addf %13, %19 : vector<18x8xf32>
    %c2 = arith.constant 2 : index
    %c0_21 = arith.constant 0 : index
    %c0_22 = arith.constant 0 : index
    %21 = vector.load %arg4[%c2, %c0_21, %c0_22] : memref<9x18x98xf32, #tpu.memory_space<vmem>>, vector<1x18x98xf32>
    %22 = vector.shape_cast %21 : vector<1x18x98xf32> to vector<18x98xf32>
    %cst_23 = arith.constant dense<0.000000e+00> : vector<18x8xf32>
    %23 = tpu.matmul %22, %7, %cst_23 {dimension_numbers = #tpu.dot_dimension_numbers<[1], [0], [0], [1], [0, 0, 1, 1], [], []>} : vector<18x98xf32>, vector<98x8xf32>, vector<18x8xf32> -> vector<18x8xf32>
    %c2_24 = arith.constant 2 : index
    %c0_25 = arith.constant 0 : index
    %c0_26 = arith.constant 0 : index
    %24 = vector.load %arg5[%c2_24, %c0_25, %c0_26] : memref<9x8x8xf32, #tpu.memory_space<vmem>>, vector<1x8x8xf32>
    %25 = vector.shape_cast %24 : vector<1x8x8xf32> to vector<8x8xf32>
    %cst_27 = arith.constant dense<0.000000e+00> : vector<18x8xf32>
    %26 = tpu.matmul %23, %25, %cst_27 {dimension_numbers = #tpu.dot_dimension_numbers<[1], [0], [0], [1], [0, 0, 1, 1], [], []>} : vector<18x8xf32>, vector<8x8xf32>, vector<18x8xf32> -> vector<18x8xf32>
    %27 = arith.addf %20, %26 : vector<18x8xf32>
    %c3 = arith.constant 3 : index
    %c0_28 = arith.constant 0 : index
    %c0_29 = arith.constant 0 : index
    %28 = vector.load %arg4[%c3, %c0_28, %c0_29] : memref<9x18x98xf32, #tpu.memory_space<vmem>>, vector<1x18x98xf32>
    %29 = vector.shape_cast %28 : vector<1x18x98xf32> to vector<18x98xf32>
    %cst_30 = arith.constant dense<0.000000e+00> : vector<18x8xf32>
    %30 = tpu.matmul %29, %7, %cst_30 {dimension_numbers = #tpu.dot_dimension_numbers<[1], [0], [0], [1], [0, 0, 1, 1], [], []>} : vector<18x98xf32>, vector<98x8xf32>, vector<18x8xf32> -> vector<18x8xf32>
    %c3_31 = arith.constant 3 : index
    %c0_32 = arith.constant 0 : index
    %c0_33 = arith.constant 0 : index
    %31 = vector.load %arg5[%c3_31, %c0_32, %c0_33] : memref<9x8x8xf32, #tpu.memory_space<vmem>>, vector<1x8x8xf32>
    %32 = vector.shape_cast %31 : vector<1x8x8xf32> to vector<8x8xf32>
    %cst_34 = arith.constant dense<0.000000e+00> : vector<18x8xf32>
    %33 = tpu.matmul %30, %32, %cst_34 {dimension_numbers = #tpu.dot_dimension_numbers<[1], [0], [0], [1], [0, 0, 1, 1], [], []>} : vector<18x8xf32>, vector<8x8xf32>, vector<18x8xf32> -> vector<18x8xf32>
    %34 = arith.addf %27, %33 : vector<18x8xf32>
    %c4 = arith.constant 4 : index
    %c0_35 = arith.constant 0 : index
    %c0_36 = arith.constant 0 : index
    %35 = vector.load %arg4[%c4, %c0_35, %c0_36] : memref<9x18x98xf32, #tpu.memory_space<vmem>>, vector<1x18x98xf32>
    %36 = vector.shape_cast %35 : vector<1x18x98xf32> to vector<18x98xf32>
    %cst_37 = arith.constant dense<0.000000e+00> : vector<18x8xf32>
    %37 = tpu.matmul %36, %7, %cst_37 {dimension_numbers = #tpu.dot_dimension_numbers<[1], [0], [0], [1], [0, 0, 1, 1], [], []>} : vector<18x98xf32>, vector<98x8xf32>, vector<18x8xf32> -> vector<18x8xf32>
    %c4_38 = arith.constant 4 : index
    %c0_39 = arith.constant 0 : index
    %c0_40 = arith.constant 0 : index
    %38 = vector.load %arg5[%c4_38, %c0_39, %c0_40] : memref<9x8x8xf32, #tpu.memory_space<vmem>>, vector<1x8x8xf32>
    %39 = vector.shape_cast %38 : vector<1x8x8xf32> to vector<8x8xf32>
    %cst_41 = arith.constant dense<0.000000e+00> : vector<18x8xf32>
    %40 = tpu.matmul %37, %39, %cst_41 {dimension_numbers = #tpu.dot_dimension_numbers<[1], [0], [0], [1], [0, 0, 1, 1], [], []>} : vector<18x8xf32>, vector<8x8xf32>, vector<18x8xf32> -> vector<18x8xf32>
    %41 = arith.addf %34, %40 : vector<18x8xf32>
    %c5 = arith.constant 5 : index
    %c0_42 = arith.constant 0 : index
    %c0_43 = arith.constant 0 : index
    %42 = vector.load %arg4[%c5, %c0_42, %c0_43] : memref<9x18x98xf32, #tpu.memory_space<vmem>>, vector<1x18x98xf32>
    %43 = vector.shape_cast %42 : vector<1x18x98xf32> to vector<18x98xf32>
    %cst_44 = arith.constant dense<0.000000e+00> : vector<18x8xf32>
    %44 = tpu.matmul %43, %7, %cst_44 {dimension_numbers = #tpu.dot_dimension_numbers<[1], [0], [0], [1], [0, 0, 1, 1], [], []>} : vector<18x98xf32>, vector<98x8xf32>, vector<18x8xf32> -> vector<18x8xf32>
    %c5_45 = arith.constant 5 : index
    %c0_46 = arith.constant 0 : index
    %c0_47 = arith.constant 0 : index
    %45 = vector.load %arg5[%c5_45, %c0_46, %c0_47] : memref<9x8x8xf32, #tpu.memory_space<vmem>>, vector<1x8x8xf32>
    %46 = vector.shape_cast %45 : vector<1x8x8xf32> to vector<8x8xf32>
    %cst_48 = arith.constant dense<0.000000e+00> : vector<18x8xf32>
    %47 = tpu.matmul %44, %46, %cst_48 {dimension_numbers = #tpu.dot_dimension_numbers<[1], [0], [0], [1], [0, 0, 1, 1], [], []>} : vector<18x8xf32>, vector<8x8xf32>, vector<18x8xf32> -> vector<18x8xf32>
    %48 = arith.addf %41, %47 : vector<18x8xf32>
    %c6 = arith.constant 6 : index
    %c0_49 = arith.constant 0 : index
    %c0_50 = arith.constant 0 : index
    %49 = vector.load %arg4[%c6, %c0_49, %c0_50] : memref<9x18x98xf32, #tpu.memory_space<vmem>>, vector<1x18x98xf32>
    %50 = vector.shape_cast %49 : vector<1x18x98xf32> to vector<18x98xf32>
    %cst_51 = arith.constant dense<0.000000e+00> : vector<18x8xf32>
    %51 = tpu.matmul %50, %7, %cst_51 {dimension_numbers = #tpu.dot_dimension_numbers<[1], [0], [0], [1], [0, 0, 1, 1], [], []>} : vector<18x98xf32>, vector<98x8xf32>, vector<18x8xf32> -> vector<18x8xf32>
    %c6_52 = arith.constant 6 : index
    %c0_53 = arith.constant 0 : index
    %c0_54 = arith.constant 0 : index
    %52 = vector.load %arg5[%c6_52, %c0_53, %c0_54] : memref<9x8x8xf32, #tpu.memory_space<vmem>>, vector<1x8x8xf32>
    %53 = vector.shape_cast %52 : vector<1x8x8xf32> to vector<8x8xf32>
    %cst_55 = arith.constant dense<0.000000e+00> : vector<18x8xf32>
    %54 = tpu.matmul %51, %53, %cst_55 {dimension_numbers = #tpu.dot_dimension_numbers<[1], [0], [0], [1], [0, 0, 1, 1], [], []>} : vector<18x8xf32>, vector<8x8xf32>, vector<18x8xf32> -> vector<18x8xf32>
    %55 = arith.addf %48, %54 : vector<18x8xf32>
    %c7 = arith.constant 7 : index
    %c0_56 = arith.constant 0 : index
    %c0_57 = arith.constant 0 : index
    %56 = vector.load %arg4[%c7, %c0_56, %c0_57] : memref<9x18x98xf32, #tpu.memory_space<vmem>>, vector<1x18x98xf32>
    %57 = vector.shape_cast %56 : vector<1x18x98xf32> to vector<18x98xf32>
    %cst_58 = arith.constant dense<0.000000e+00> : vector<18x8xf32>
    %58 = tpu.matmul %57, %7, %cst_58 {dimension_numbers = #tpu.dot_dimension_numbers<[1], [0], [0], [1], [0, 0, 1, 1], [], []>} : vector<18x98xf32>, vector<98x8xf32>, vector<18x8xf32> -> vector<18x8xf32>
    %c7_59 = arith.constant 7 : index
    %c0_60 = arith.constant 0 : index
    %c0_61 = arith.constant 0 : index
    %59 = vector.load %arg5[%c7_59, %c0_60, %c0_61] : memref<9x8x8xf32, #tpu.memory_space<vmem>>, vector<1x8x8xf32>
    %60 = vector.shape_cast %59 : vector<1x8x8xf32> to vector<8x8xf32>
    %cst_62 = arith.constant dense<0.000000e+00> : vector<18x8xf32>
    %61 = tpu.matmul %58, %60, %cst_62 {dimension_numbers = #tpu.dot_dimension_numbers<[1], [0], [0], [1], [0, 0, 1, 1], [], []>} : vector<18x8xf32>, vector<8x8xf32>, vector<18x8xf32> -> vector<18x8xf32>
    %62 = arith.addf %55, %61 : vector<18x8xf32>
    %c8 = arith.constant 8 : index
    %c0_63 = arith.constant 0 : index
    %c0_64 = arith.constant 0 : index
    %63 = vector.load %arg4[%c8, %c0_63, %c0_64] : memref<9x18x98xf32, #tpu.memory_space<vmem>>, vector<1x18x98xf32>
    %64 = vector.shape_cast %63 : vector<1x18x98xf32> to vector<18x98xf32>
    %cst_65 = arith.constant dense<0.000000e+00> : vector<18x8xf32>
    %65 = tpu.matmul %64, %7, %cst_65 {dimension_numbers = #tpu.dot_dimension_numbers<[1], [0], [0], [1], [0, 0, 1, 1], [], []>} : vector<18x98xf32>, vector<98x8xf32>, vector<18x8xf32> -> vector<18x8xf32>
    %c8_66 = arith.constant 8 : index
    %c0_67 = arith.constant 0 : index
    %c0_68 = arith.constant 0 : index
    %66 = vector.load %arg5[%c8_66, %c0_67, %c0_68] : memref<9x8x8xf32, #tpu.memory_space<vmem>>, vector<1x8x8xf32>
    %67 = vector.shape_cast %66 : vector<1x8x8xf32> to vector<8x8xf32>
    %cst_69 = arith.constant dense<0.000000e+00> : vector<18x8xf32>
    %68 = tpu.matmul %65, %67, %cst_69 {dimension_numbers = #tpu.dot_dimension_numbers<[1], [0], [0], [1], [0, 0, 1, 1], [], []>} : vector<18x8xf32>, vector<8x8xf32>, vector<18x8xf32> -> vector<18x8xf32>
    %69 = arith.addf %62, %68 : vector<18x8xf32>
    %c0_70 = arith.constant 0 : index
    %c0_71 = arith.constant 0 : index
    %70 = vector.load %arg6[%c0_70, %c0_71] : memref<1x8xf32, #tpu.memory_space<vmem>>, vector<1x8xf32>
    %71 = vector.broadcast %70 : vector<1x8xf32> to vector<18x8xf32>
    %72 = arith.addf %69, %71 : vector<18x8xf32>
    %73 = math.tanh %72 : vector<18x8xf32>
    %c0_72 = arith.constant 0 : index
    %c0_73 = arith.constant 0 : index
    %c0_74 = arith.constant 0 : index
    %74 = vector.load %arg7[%c0_72, %c0_73, %c0_74] : memref<9x2x18xf32, #tpu.memory_space<vmem>>, vector<1x2x18xf32>
    %75 = vector.shape_cast %74 : vector<1x2x18xf32> to vector<2x18xf32>
    %cst_75 = arith.constant dense<0.000000e+00> : vector<2x8xf32>
    %76 = tpu.matmul %75, %73, %cst_75 {dimension_numbers = #tpu.dot_dimension_numbers<[1], [0], [0], [1], [0, 0, 1, 1], [], []>} : vector<2x18xf32>, vector<18x8xf32>, vector<2x8xf32> -> vector<2x8xf32>
    %c0_76 = arith.constant 0 : index
    %c0_77 = arith.constant 0 : index
    %c0_78 = arith.constant 0 : index
    %77 = vector.load %arg8[%c0_76, %c0_77, %c0_78] : memref<9x8x8xf32, #tpu.memory_space<vmem>>, vector<1x8x8xf32>
    %78 = vector.shape_cast %77 : vector<1x8x8xf32> to vector<8x8xf32>
    %cst_79 = arith.constant dense<0.000000e+00> : vector<2x8xf32>
    %79 = tpu.matmul %76, %78, %cst_79 {dimension_numbers = #tpu.dot_dimension_numbers<[1], [0], [0], [1], [0, 0, 1, 1], [], []>} : vector<2x8xf32>, vector<8x8xf32>, vector<2x8xf32> -> vector<2x8xf32>
    %c1_80 = arith.constant 1 : index
    %c0_81 = arith.constant 0 : index
    %c0_82 = arith.constant 0 : index
    %80 = vector.load %arg7[%c1_80, %c0_81, %c0_82] : memref<9x2x18xf32, #tpu.memory_space<vmem>>, vector<1x2x18xf32>
    %81 = vector.shape_cast %80 : vector<1x2x18xf32> to vector<2x18xf32>
    %cst_83 = arith.constant dense<0.000000e+00> : vector<2x8xf32>
    %82 = tpu.matmul %81, %73, %cst_83 {dimension_numbers = #tpu.dot_dimension_numbers<[1], [0], [0], [1], [0, 0, 1, 1], [], []>} : vector<2x18xf32>, vector<18x8xf32>, vector<2x8xf32> -> vector<2x8xf32>
    %c1_84 = arith.constant 1 : index
    %c0_85 = arith.constant 0 : index
    %c0_86 = arith.constant 0 : index
    %83 = vector.load %arg8[%c1_84, %c0_85, %c0_86] : memref<9x8x8xf32, #tpu.memory_space<vmem>>, vector<1x8x8xf32>
    %84 = vector.shape_cast %83 : vector<1x8x8xf32> to vector<8x8xf32>
    %cst_87 = arith.constant dense<0.000000e+00> : vector<2x8xf32>
    %85 = tpu.matmul %82, %84, %cst_87 {dimension_numbers = #tpu.dot_dimension_numbers<[1], [0], [0], [1], [0, 0, 1, 1], [], []>} : vector<2x8xf32>, vector<8x8xf32>, vector<2x8xf32> -> vector<2x8xf32>
    %86 = arith.addf %79, %85 : vector<2x8xf32>
    %c2_88 = arith.constant 2 : index
    %c0_89 = arith.constant 0 : index
    %c0_90 = arith.constant 0 : index
    %87 = vector.load %arg7[%c2_88, %c0_89, %c0_90] : memref<9x2x18xf32, #tpu.memory_space<vmem>>, vector<1x2x18xf32>
    %88 = vector.shape_cast %87 : vector<1x2x18xf32> to vector<2x18xf32>
    %cst_91 = arith.constant dense<0.000000e+00> : vector<2x8xf32>
    %89 = tpu.matmul %88, %73, %cst_91 {dimension_numbers = #tpu.dot_dimension_numbers<[1], [0], [0], [1], [0, 0, 1, 1], [], []>} : vector<2x18xf32>, vector<18x8xf32>, vector<2x8xf32> -> vector<2x8xf32>
    %c2_92 = arith.constant 2 : index
    %c0_93 = arith.constant 0 : index
    %c0_94 = arith.constant 0 : index
    %90 = vector.load %arg8[%c2_92, %c0_93, %c0_94] : memref<9x8x8xf32, #tpu.memory_space<vmem>>, vector<1x8x8xf32>
    %91 = vector.shape_cast %90 : vector<1x8x8xf32> to vector<8x8xf32>
    %cst_95 = arith.constant dense<0.000000e+00> : vector<2x8xf32>
    %92 = tpu.matmul %89, %91, %cst_95 {dimension_numbers = #tpu.dot_dimension_numbers<[1], [0], [0], [1], [0, 0, 1, 1], [], []>} : vector<2x8xf32>, vector<8x8xf32>, vector<2x8xf32> -> vector<2x8xf32>
    %93 = arith.addf %86, %92 : vector<2x8xf32>
    %c3_96 = arith.constant 3 : index
    %c0_97 = arith.constant 0 : index
    %c0_98 = arith.constant 0 : index
    %94 = vector.load %arg7[%c3_96, %c0_97, %c0_98] : memref<9x2x18xf32, #tpu.memory_space<vmem>>, vector<1x2x18xf32>
    %95 = vector.shape_cast %94 : vector<1x2x18xf32> to vector<2x18xf32>
    %cst_99 = arith.constant dense<0.000000e+00> : vector<2x8xf32>
    %96 = tpu.matmul %95, %73, %cst_99 {dimension_numbers = #tpu.dot_dimension_numbers<[1], [0], [0], [1], [0, 0, 1, 1], [], []>} : vector<2x18xf32>, vector<18x8xf32>, vector<2x8xf32> -> vector<2x8xf32>
    %c3_100 = arith.constant 3 : index
    %c0_101 = arith.constant 0 : index
    %c0_102 = arith.constant 0 : index
    %97 = vector.load %arg8[%c3_100, %c0_101, %c0_102] : memref<9x8x8xf32, #tpu.memory_space<vmem>>, vector<1x8x8xf32>
    %98 = vector.shape_cast %97 : vector<1x8x8xf32> to vector<8x8xf32>
    %cst_103 = arith.constant dense<0.000000e+00> : vector<2x8xf32>
    %99 = tpu.matmul %96, %98, %cst_103 {dimension_numbers = #tpu.dot_dimension_numbers<[1], [0], [0], [1], [0, 0, 1, 1], [], []>} : vector<2x8xf32>, vector<8x8xf32>, vector<2x8xf32> -> vector<2x8xf32>
    %100 = arith.addf %93, %99 : vector<2x8xf32>
    %c4_104 = arith.constant 4 : index
    %c0_105 = arith.constant 0 : index
    %c0_106 = arith.constant 0 : index
    %101 = vector.load %arg7[%c4_104, %c0_105, %c0_106] : memref<9x2x18xf32, #tpu.memory_space<vmem>>, vector<1x2x18xf32>
    %102 = vector.shape_cast %101 : vector<1x2x18xf32> to vector<2x18xf32>
    %cst_107 = arith.constant dense<0.000000e+00> : vector<2x8xf32>
    %103 = tpu.matmul %102, %73, %cst_107 {dimension_numbers = #tpu.dot_dimension_numbers<[1], [0], [0], [1], [0, 0, 1, 1], [], []>} : vector<2x18xf32>, vector<18x8xf32>, vector<2x8xf32> -> vector<2x8xf32>
    %c4_108 = arith.constant 4 : index
    %c0_109 = arith.constant 0 : index
    %c0_110 = arith.constant 0 : index
    %104 = vector.load %arg8[%c4_108, %c0_109, %c0_110] : memref<9x8x8xf32, #tpu.memory_space<vmem>>, vector<1x8x8xf32>
    %105 = vector.shape_cast %104 : vector<1x8x8xf32> to vector<8x8xf32>
    %cst_111 = arith.constant dense<0.000000e+00> : vector<2x8xf32>
    %106 = tpu.matmul %103, %105, %cst_111 {dimension_numbers = #tpu.dot_dimension_numbers<[1], [0], [0], [1], [0, 0, 1, 1], [], []>} : vector<2x8xf32>, vector<8x8xf32>, vector<2x8xf32> -> vector<2x8xf32>
    %107 = arith.addf %100, %106 : vector<2x8xf32>
    %c5_112 = arith.constant 5 : index
    %c0_113 = arith.constant 0 : index
    %c0_114 = arith.constant 0 : index
    %108 = vector.load %arg7[%c5_112, %c0_113, %c0_114] : memref<9x2x18xf32, #tpu.memory_space<vmem>>, vector<1x2x18xf32>
    %109 = vector.shape_cast %108 : vector<1x2x18xf32> to vector<2x18xf32>
    %cst_115 = arith.constant dense<0.000000e+00> : vector<2x8xf32>
    %110 = tpu.matmul %109, %73, %cst_115 {dimension_numbers = #tpu.dot_dimension_numbers<[1], [0], [0], [1], [0, 0, 1, 1], [], []>} : vector<2x18xf32>, vector<18x8xf32>, vector<2x8xf32> -> vector<2x8xf32>
    %c5_116 = arith.constant 5 : index
    %c0_117 = arith.constant 0 : index
    %c0_118 = arith.constant 0 : index
    %111 = vector.load %arg8[%c5_116, %c0_117, %c0_118] : memref<9x8x8xf32, #tpu.memory_space<vmem>>, vector<1x8x8xf32>
    %112 = vector.shape_cast %111 : vector<1x8x8xf32> to vector<8x8xf32>
    %cst_119 = arith.constant dense<0.000000e+00> : vector<2x8xf32>
    %113 = tpu.matmul %110, %112, %cst_119 {dimension_numbers = #tpu.dot_dimension_numbers<[1], [0], [0], [1], [0, 0, 1, 1], [], []>} : vector<2x8xf32>, vector<8x8xf32>, vector<2x8xf32> -> vector<2x8xf32>
    %114 = arith.addf %107, %113 : vector<2x8xf32>
    %c6_120 = arith.constant 6 : index
    %c0_121 = arith.constant 0 : index
    %c0_122 = arith.constant 0 : index
    %115 = vector.load %arg7[%c6_120, %c0_121, %c0_122] : memref<9x2x18xf32, #tpu.memory_space<vmem>>, vector<1x2x18xf32>
    %116 = vector.shape_cast %115 : vector<1x2x18xf32> to vector<2x18xf32>
    %cst_123 = arith.constant dense<0.000000e+00> : vector<2x8xf32>
    %117 = tpu.matmul %116, %73, %cst_123 {dimension_numbers = #tpu.dot_dimension_numbers<[1], [0], [0], [1], [0, 0, 1, 1], [], []>} : vector<2x18xf32>, vector<18x8xf32>, vector<2x8xf32> -> vector<2x8xf32>
    %c6_124 = arith.constant 6 : index
    %c0_125 = arith.constant 0 : index
    %c0_126 = arith.constant 0 : index
    %118 = vector.load %arg8[%c6_124, %c0_125, %c0_126] : memref<9x8x8xf32, #tpu.memory_space<vmem>>, vector<1x8x8xf32>
    %119 = vector.shape_cast %118 : vector<1x8x8xf32> to vector<8x8xf32>
    %cst_127 = arith.constant dense<0.000000e+00> : vector<2x8xf32>
    %120 = tpu.matmul %117, %119, %cst_127 {dimension_numbers = #tpu.dot_dimension_numbers<[1], [0], [0], [1], [0, 0, 1, 1], [], []>} : vector<2x8xf32>, vector<8x8xf32>, vector<2x8xf32> -> vector<2x8xf32>
    %121 = arith.addf %114, %120 : vector<2x8xf32>
    %c7_128 = arith.constant 7 : index
    %c0_129 = arith.constant 0 : index
    %c0_130 = arith.constant 0 : index
    %122 = vector.load %arg7[%c7_128, %c0_129, %c0_130] : memref<9x2x18xf32, #tpu.memory_space<vmem>>, vector<1x2x18xf32>
    %123 = vector.shape_cast %122 : vector<1x2x18xf32> to vector<2x18xf32>
    %cst_131 = arith.constant dense<0.000000e+00> : vector<2x8xf32>
    %124 = tpu.matmul %123, %73, %cst_131 {dimension_numbers = #tpu.dot_dimension_numbers<[1], [0], [0], [1], [0, 0, 1, 1], [], []>} : vector<2x18xf32>, vector<18x8xf32>, vector<2x8xf32> -> vector<2x8xf32>
    %c7_132 = arith.constant 7 : index
    %c0_133 = arith.constant 0 : index
    %c0_134 = arith.constant 0 : index
    %125 = vector.load %arg8[%c7_132, %c0_133, %c0_134] : memref<9x8x8xf32, #tpu.memory_space<vmem>>, vector<1x8x8xf32>
    %126 = vector.shape_cast %125 : vector<1x8x8xf32> to vector<8x8xf32>
    %cst_135 = arith.constant dense<0.000000e+00> : vector<2x8xf32>
    %127 = tpu.matmul %124, %126, %cst_135 {dimension_numbers = #tpu.dot_dimension_numbers<[1], [0], [0], [1], [0, 0, 1, 1], [], []>} : vector<2x8xf32>, vector<8x8xf32>, vector<2x8xf32> -> vector<2x8xf32>
    %128 = arith.addf %121, %127 : vector<2x8xf32>
    %c8_136 = arith.constant 8 : index
    %c0_137 = arith.constant 0 : index
    %c0_138 = arith.constant 0 : index
    %129 = vector.load %arg7[%c8_136, %c0_137, %c0_138] : memref<9x2x18xf32, #tpu.memory_space<vmem>>, vector<1x2x18xf32>
    %130 = vector.shape_cast %129 : vector<1x2x18xf32> to vector<2x18xf32>
    %cst_139 = arith.constant dense<0.000000e+00> : vector<2x8xf32>
    %131 = tpu.matmul %130, %73, %cst_139 {dimension_numbers = #tpu.dot_dimension_numbers<[1], [0], [0], [1], [0, 0, 1, 1], [], []>} : vector<2x18xf32>, vector<18x8xf32>, vector<2x8xf32> -> vector<2x8xf32>
    %c8_140 = arith.constant 8 : index
    %c0_141 = arith.constant 0 : index
    %c0_142 = arith.constant 0 : index
    %132 = vector.load %arg8[%c8_140, %c0_141, %c0_142] : memref<9x8x8xf32, #tpu.memory_space<vmem>>, vector<1x8x8xf32>
    %133 = vector.shape_cast %132 : vector<1x8x8xf32> to vector<8x8xf32>
    %cst_143 = arith.constant dense<0.000000e+00> : vector<2x8xf32>
    %134 = tpu.matmul %131, %133, %cst_143 {dimension_numbers = #tpu.dot_dimension_numbers<[1], [0], [0], [1], [0, 0, 1, 1], [], []>} : vector<2x8xf32>, vector<8x8xf32>, vector<2x8xf32> -> vector<2x8xf32>
    %135 = arith.addf %128, %134 : vector<2x8xf32>
    %c0_144 = arith.constant 0 : index
    %c0_145 = arith.constant 0 : index
    %136 = vector.load %arg9[%c0_144, %c0_145] : memref<1x8xf32, #tpu.memory_space<vmem>>, vector<1x8xf32>
    %137 = vector.broadcast %136 : vector<1x8xf32> to vector<2x8xf32>
    %138 = arith.addf %135, %137 : vector<2x8xf32>
    %139 = math.tanh %138 : vector<2x8xf32>
    %c0_146 = arith.constant 0 : index
    %c0_147 = arith.constant 0 : index
    %140 = vector.load %arg10[%c0_146, %c0_147] : memref<8x32xf32, #tpu.memory_space<vmem>>, vector<8x32xf32>
    %cst_148 = arith.constant dense<0.000000e+00> : vector<2x32xf32>
    %141 = tpu.matmul %139, %140, %cst_148 {dimension_numbers = #tpu.dot_dimension_numbers<[1], [0], [0], [1], [0, 0, 1, 1], [], []>} : vector<2x8xf32>, vector<8x32xf32>, vector<2x32xf32> -> vector<2x32xf32>
    %c0_149 = arith.constant 0 : index
    %c0_150 = arith.constant 0 : index
    %142 = vector.load %arg11[%c0_149, %c0_150] : memref<1x32xf32, #tpu.memory_space<vmem>>, vector<1x32xf32>
    %143 = vector.broadcast %142 : vector<1x32xf32> to vector<2x32xf32>
    %144 = arith.addf %141, %143 : vector<2x32xf32>
    %145 = math.tanh %144 : vector<2x32xf32>
    %c0_151 = arith.constant 0 : index
    %c0_152 = arith.constant 0 : index
    %146 = vector.load %arg12[%c0_151, %c0_152] : memref<32x4xf32, #tpu.memory_space<vmem>>, vector<32x4xf32>
    %cst_153 = arith.constant dense<0.000000e+00> : vector<2x4xf32>
    %147 = tpu.matmul %145, %146, %cst_153 {dimension_numbers = #tpu.dot_dimension_numbers<[1], [0], [0], [1], [0, 0, 1, 1], [], []>} : vector<2x32xf32>, vector<32x4xf32>, vector<2x4xf32> -> vector<2x4xf32>
    %c0_154 = arith.constant 0 : index
    %c0_155 = arith.constant 0 : index
    %148 = vector.load %arg13[%c0_154, %c0_155] : memref<1x4xf32, #tpu.memory_space<vmem>>, vector<1x4xf32>
    %149 = vector.broadcast %148 : vector<1x4xf32> to vector<2x4xf32>
    %150 = arith.addf %147, %149 : vector<2x4xf32>
    %151 = tpu.iota {dimensions = array<i32: 1>} : vector<2x4xi32>
    %cst_156 = arith.constant dense<0xFF800000> : vector<2xf32>
    %152 = vector.multi_reduction <maximumf>, %150, %cst_156 [1] : vector<2x4xf32> to vector<2xf32>
    %153 = vector.shape_cast %152 : vector<2xf32> to vector<2x1xf32>
    %154 = vector.broadcast %153 : vector<2x1xf32> to vector<2x4xf32>
    %155 = arith.cmpf oeq, %150, %154 : vector<2x4xf32>
    %c4_i32 = arith.constant 4 : i32
    %156 = vector.broadcast %c4_i32 : i32 to vector<2x4xi32>
    %157 = arith.select %155, %151, %156 : vector<2x4xi1>, vector<2x4xi32>
    %cst_157 = arith.constant dense<2147483647> : vector<2xi32>
    %158 = vector.multi_reduction <minsi>, %157, %cst_157 [1] : vector<2x4xi32> to vector<2xi32>
    %159 = vector.shape_cast %158 : vector<2xi32> to vector<2x1xi32>
    %c0_158 = arith.constant 0 : index
    %c0_159 = arith.constant 0 : index
    %c0_160 = arith.constant 0 : index
    %160 = vector.load %arg14[%c0_158, %c0_159, %c0_160] : memref<1x2x1xi32, #tpu.memory_space<vmem>>, vector<1x2x1xi32>
    %161 = vector.shape_cast %160 : vector<1x2x1xi32> to vector<2x1xi32>
    %162 = vector.shape_cast %159 : vector<2x1xi32> to vector<1x2x1xi32>
    tpu.vector_store %arg14[%c0_158, %c0_159, %c0_160], %162 {strides = array<i32>} : memref<1x2x1xi32, #tpu.memory_space<vmem>>, vector<1x2x1xi32>,
    return
  }
  func.func @transform_0(%arg0: i32) -> (i32, i32, i32) {
    %c0_i32 = arith.constant 0 : i32
    %c0_i32_0 = arith.constant 0 : i32
    %c0_i32_1 = arith.constant 0 : i32
    return %arg0, %c0_i32, %c0_i32_0 : i32, i32, i32
  }
  func.func @transform_1(%arg0: i32) -> (i32, i32) {
    %c0_i32 = arith.constant 0 : i32
    %c0_i32_0 = arith.constant 0 : i32
    %c0_i32_1 = arith.constant 0 : i32
    return %c0_i32, %c0_i32_0 : i32, i32
  }
  func.func @transform_2(%arg0: i32) -> (i32, i32) {
    %c0_i32 = arith.constant 0 : i32
    %c0_i32_0 = arith.constant 0 : i32
    %c0_i32_1 = arith.constant 0 : i32
    return %c0_i32, %c0_i32_0 : i32, i32
  }
  func.func @transform_3(%arg0: i32) -> (i32, i32, i32) {
    %c0_i32 = arith.constant 0 : i32
    %c0_i32_0 = arith.constant 0 : i32
    %c0_i32_1 = arith.constant 0 : i32
    %c0_i32_2 = arith.constant 0 : i32
    return %c0_i32, %c0_i32_0, %c0_i32_1 : i32, i32, i32
  }
  func.func @transform_4(%arg0: i32) -> (i32, i32, i32) {
    %c0_i32 = arith.constant 0 : i32
    %c0_i32_0 = arith.constant 0 : i32
    %c0_i32_1 = arith.constant 0 : i32
    %c0_i32_2 = arith.constant 0 : i32
    return %c0_i32, %c0_i32_0, %c0_i32_1 : i32, i32, i32
  }
  func.func @transform_5(%arg0: i32) -> (i32, i32) {
    %c0_i32 = arith.constant 0 : i32
    %c0_i32_0 = arith.constant 0 : i32
    %c0_i32_1 = arith.constant 0 : i32
    return %c0_i32, %c0_i32_0 : i32, i32
  }
  func.func @transform_6(%arg0: i32) -> (i32, i32, i32) {
    %c0_i32 = arith.constant 0 : i32
    %c0_i32_0 = arith.constant 0 : i32
    %c0_i32_1 = arith.constant 0 : i32
    %c0_i32_2 = arith.constant 0 : i32
    return %c0_i32, %c0_i32_0, %c0_i32_1 : i32, i32, i32
  }
  func.func @transform_7(%arg0: i32) -> (i32, i32, i32) {
    %c0_i32 = arith.constant 0 : i32
    %c0_i32_0 = arith.constant 0 : i32
    %c0_i32_1 = arith.constant 0 : i32
    %c0_i32_2 = arith.constant 0 : i32
    return %c0_i32, %c0_i32_0, %c0_i32_1 : i32, i32, i32
  }
  func.func @transform_8(%arg0: i32) -> (i32, i32) {
    %c0_i32 = arith.constant 0 : i32
    %c0_i32_0 = arith.constant 0 : i32
    %c0_i32_1 = arith.constant 0 : i32
    return %c0_i32, %c0_i32_0 : i32, i32
  }
  func.func @transform_9(%arg0: i32) -> (i32, i32) {
    %c0_i32 = arith.constant 0 : i32
    %c0_i32_0 = arith.constant 0 : i32
    %c0_i32_1 = arith.constant 0 : i32
    return %c0_i32, %c0_i32_0 : i32, i32
  }
  func.func @transform_10(%arg0: i32) -> (i32, i32) {
    %c0_i32 = arith.constant 0 : i32
    %c0_i32_0 = arith.constant 0 : i32
    %c0_i32_1 = arith.constant 0 : i32
    return %c0_i32, %c0_i32_0 : i32, i32
  }
  func.func @transform_11(%arg0: i32) -> (i32, i32) {
    %c0_i32 = arith.constant 0 : i32
    %c0_i32_0 = arith.constant 0 : i32
    %c0_i32_1 = arith.constant 0 : i32
    return %c0_i32, %c0_i32_0 : i32, i32
  }
  func.func @transform_12(%arg0: i32) -> (i32, i32) {
    %c0_i32 = arith.constant 0 : i32
    %c0_i32_0 = arith.constant 0 : i32
    %c0_i32_1 = arith.constant 0 : i32
    return %c0_i32, %c0_i32_0 : i32, i32
  }
  func.func @transform_13(%arg0: i32) -> (i32, i32, i32) {
    %c0_i32 = arith.constant 0 : i32
    %c0_i32_0 = arith.constant 0 : i32
    %c0_i32_1 = arith.constant 0 : i32
    return %arg0, %c0_i32, %c0_i32_0 : i32, i32, i32
  }
}

</mosaic_0001>

<bundles_post_ra>
// kernel: net_forward.1
= control target key start
LH: loop header
LB: loop body
LE: loop exit
PB: predicated region body
PF: predicated region fallthrough
CT: control target
= control target key end

     0   :  { %vm108_vm0 = vcmask 1042432   ;;  %v4571_v0 = vmov 0.0   ;;  %vm4572_vm1 = vmmov 0   ;;  %vm68_vm2 = vcmask 220160   ;;  %s5514_s1 = inlined_call_operand.vmem [shape: f32[27,8], index: 1, kind: input, shape index: {}]   ;;  %s5515_s0 = inlined_call_operand.vmem [shape: f32[1,98,27], index: 0, kind: input, shape index: {}]   ;;  %s5516_s4 = inlined_call_operand.vmem [shape: f32[9,8,8], index: 4, kind: input, shape index: {}]   ;;  %s5517_s2 = inlined_call_operand.vmem [shape: f32[1,8], index: 2, kind: input, shape index: {}]   ;;  %s5518_s3 = inlined_call_operand.vmem [shape: f32[9,18,98], index: 3, kind: input, shape index: {}]   ;;  %s5519_s5 = inlined_call_operand.vmem [shape: f32[1,8], index: 5, kind: input, shape index: {}]   ;;  %s5520_s6 = inlined_call_operand.vmem [shape: f32[9,2,18], index: 6, kind: input, shape index: {}]   ;;  %s5521_s7 = inlined_call_operand.vmem [shape: f32[9,8,8], index: 7, kind: input, shape index: {}]   ;;  %s5522_s9 = inlined_call_operand.vmem [shape: f32[8,32], index: 9, kind: input, shape index: {}]   ;;  %s5523_s8 = inlined_call_operand.vmem [shape: f32[1,8], index: 8, kind: input, shape index: {}]   ;;  %s5524_s11 = inlined_call_operand.vmem [shape: f32[32,4], index: 11, kind: input, shape index: {}]   ;;  %s5525_s10 = inlined_call_operand.vmem [shape: f32[1,32], index: 10, kind: input, shape index: {}]   ;;  %s5526_s12 = inlined_call_operand.vmem [shape: f32[1,4], index: 12, kind: input, shape index: {}]   ;;  %s5527_s13 = inlined_call_operand.vmem [shape: s32[1,2,1], index: 13, kind: output, shape index: {}]  }
   0x1   :  { %3930 = vmatprep.subr.mxu0 %v4571_v0  ;;  %v60_v1 = vld [vmem:[%s5514_s1 + $0x18] sm:$0x7]  ;;  %v59_v2 = vld [vmem:[%s5514_s1 + $0x10] sm:$0xff]  ;;  %3938 = vmatprep.mubr.msk.f32.mxu0 %vm4572_vm1, %v4571_v0  ;;  %v58_v3 = vld [vmem:[%s5514_s1 + $0x8] sm:$0xff]  ;;  %vm268_vm3 = vcmask 1041408   ;;  %vm258_vm4 = vcmask 801792  }
   0x2   :  { %3931 = vmatpush3.msk.msra.mxu0 %vm108_vm0, %v60_v1  ;;  %3977 = vmatprep.subr.mxu1 %v4571_v0  ;;  %v57_v4 = vld [vmem:[%s5514_s1] sm:$0xff]  ;;  %v45_v6 = vld [vmem:[%s5515_s0 + $0x8] sm:$0xff]  ;;  %v46_v7 = vld [vmem:[%s5515_s0 + $0x10] sm:$0xff]  ;;  %vm448_vm5 = vcmask 64512   ;;  %vm1950_vm6 = vcmask 146432   ;;  %vm3410_vm7 = vcmask 261120  }
   0x3   :  { %3932 = vmatprep.subr.mxu0 %v4571_v0  ;;  %4003 = vmatprep.mubr.msk.f32.mxu1 %vm4572_vm1, %v4571_v0  ;;  %v44_v5 = vld [vmem:[%s5515_s0] sm:$0xff]  ;;  %v47_v8 = vld [vmem:[%s5515_s0 + $0x18] sm:$0xff]  ;;  %v49_v10 = vld [vmem:[%s5515_s0 + $0x28] sm:$0xff]  ;;  %vm3486_vm8 = vcmask 25600   ;;  %vm3507_vm11 = vcmask 1024  }
   0x4   :  { %3933 = vmatpush3.msra.mxu0 %v59_v2  ;;  %v48_v9 = vld [vmem:[%s5515_s0 + $0x20] sm:$0xff]  ;;  %v50_v11 = vld [vmem:[%s5515_s0 + $0x30] sm:$0xff]  ;;  %v51_v12 = vld [vmem:[%s5515_s0 + $0x38] sm:$0xff] }
   0x5   :  { %3934 = vmatprep.subr.mxu0 %v4571_v0  ;;  %v52_v13 = vld [vmem:[%s5515_s0 + $0x40] sm:$0xff]  ;;  %v53_v14 = vld [vmem:[%s5515_s0 + $0x48] sm:$0xff]  ;;  %v54_v15 = vld [vmem:[%s5515_s0 + $0x50] sm:$0xff] }
   0x6   :  { %3935 = vmatpush3.msra.mxu0 %v58_v3  ;;  %v55_v16 = vld [vmem:[%s5515_s0 + $0x58] sm:$0xff]  ;;  %v56_v17 = vld [vmem:[%s5515_s0 + $0x60] sm:$0x3]  ;;  %v3539_v18 = vld [vmem:[%s5516_s4 + $0x8] sm:$0xff] }
   0x7   :  { %3936 = vmatprep.subr.mxu0 %v4571_v0  ;;  %v3513_v43 = vld [vmem:[%s5517_s2] ss:$0 sm:$0xff] }
   0x8   :  { %3937 = vmatpush3.msra.mxu0 %v57_v4 }
   0x9   :  { %3939 = vmatmul.mubr.msk.f32.vlgmr.msra.gmra.mxu0 %vm68_vm2, %v44_v5  ;;  %4047 = vmatprep.subr.mxu0 %v4571_v0 }
   0xa   :  { %3941 = vmatprep.mubr.msk.f32.mxu0 %vm4572_vm1, %v4571_v0  ;;  %4048 = vmatpush3.msra.mxu0 %v3539_v18 }
   0xb   :  { %4069 = vmatprep.subr.mxu0 %v4571_v0 }
   0xd   :  { %3942 = vmatmul.mubr.msk.f32.gmra.mxu0 %vm68_vm2, %v45_v6 }
   0xe   :  { %3944 = vmatprep.mubr.msk.f32.mxu0 %vm4572_vm1, %v4571_v0 }
  0x11   :  { %3945 = vmatmul.mubr.msk.f32.gmra.mxu0 %vm68_vm2, %v46_v7 }
  0x12   :  { %3947 = vmatprep.mubr.msk.f32.mxu0 %vm4572_vm1, %v4571_v0 }
  0x15   :  { %3948 = vmatmul.mubr.msk.f32.gmra.mxu0 %vm68_vm2, %v47_v8  ;;  %v255_v8 = vld [vmem:[%s5518_s3] sm:$0xff] }
  0x16   :  { %3950 = vmatprep.mubr.msk.f32.mxu0 %vm4572_vm1, %v4571_v0 }
  0x19   :  { %3951 = vmatmul.mubr.msk.f32.gmra.mxu0 %vm68_vm2, %v48_v9 }
  0x1a   :  { %3953 = vmatprep.mubr.msk.f32.mxu0 %vm4572_vm1, %v4571_v0 }
  0x1d   :  { %3954 = vmatmul.mubr.msk.f32.gmra.mxu0 %vm68_vm2, %v49_v10  ;;  %v256_v10 = vld [vmem:[%s5518_s3 + $0x8] sm:$0xff] }
  0x1e   :  { %3956 = vmatprep.mubr.msk.f32.mxu0 %vm4572_vm1, %v4571_v0 }
  0x21   :  { %3957 = vmatmul.mubr.msk.f32.gmra.mxu0 %vm68_vm2, %v50_v11  ;;  %v257_v11 = vld [vmem:[%s5518_s3 + $0x10] sm:$0x3] }
  0x22   :  { %3959 = vmatprep.mubr.msk.f32.mxu0 %vm4572_vm1, %v4571_v0 }
  0x25   :  { %3960 = vmatmul.mubr.msk.f32.gmra.mxu0 %vm68_vm2, %v51_v12  ;;  %v3532_v12 = vld [vmem:[%s5518_s3 + $0x18] sm:$0xff] }
  0x26   :  { %3962 = vmatprep.mubr.msk.f32.mxu0 %vm4572_vm1, %v4571_v0 }
  0x29   :  { %3963 = vmatmul.mubr.msk.f32.gmra.mxu0 %vm68_vm2, %v52_v13  ;;  %v3533_v13 = vld [vmem:[%s5518_s3 + $0x20] sm:$0xff] }
  0x2a   :  { %3965 = vmatprep.mubr.msk.f32.mxu0 %vm4572_vm1, %v4571_v0 }
  0x2d   :  { %3966 = vmatmul.mubr.msk.f32.gmra.mxu0 %vm68_vm2, %v53_v14  ;;  %v3534_v14 = vld [vmem:[%s5518_s3 + $0x28] sm:$0x3] }
  0x2e   :  { %3968 = vmatprep.mubr.msk.f32.mxu0 %vm4572_vm1, %v4571_v0 }
  0x31   :  { %3969 = vmatmul.mubr.msk.f32.gmra.mxu0 %vm68_vm2, %v54_v15  ;;  %v352_v15 = vld [vmem:[%s5516_s4] sm:$0xff] }
  0x32   :  { %3971 = vmatprep.mubr.msk.f32.mxu0 %vm4572_vm1, %v4571_v0 }
  0x35   :  { %3972 = vmatmul.mubr.msk.f32.gmra.mxu0 %vm68_vm2, %v55_v16 }
  0x36   :  { %3974 = vmatprep.mubr.msk.f32.mxu0 %vm4572_vm1, %v4571_v0 }
  0x39   :  { %3975 = vmatmul.mubr.msk.f32.gmra.mxu0 %vm68_vm2, %v56_v17 }
  0x3a   :  { %4049 = vmatprep.mubr.msk.f32.mxu0 %vm4572_vm1, %v4571_v0 }
  0xc9   :  { %v178_v19 = vpop.f32.mrf.mxu0 }
  0xca   :  { %v179_v62 = vadd.f32 %v3513_v43, %v178_v19 }
  0xcb   :  { %v3940_v20 = vpop.f32.mrf.mxu0 }
  0xcd   :  { %v183_v21 = vpop.f32.mrf.mxu0 }
  0xce   :  { %v184_v60 = vadd.f32 %v3513_v43, %v183_v21 }
  0xcf   :  { %v3943_v22 = vpop.f32.mrf.mxu0 }
  0xd1   :  { %v188_v23 = vpop.f32.mrf.mxu0 }
  0xd2   :  { %v189_v58 = vadd.f32 %v3513_v43, %v188_v23 }
  0xd3   :  { %v3946_v24 = vpop.f32.mrf.mxu0 }
  0xd5   :  { %v193_v25 = vpop.f32.mrf.mxu0 }
  0xd6   :  { %v194_v56 = vadd.f32 %v3513_v43, %v193_v25 }
  0xd7   :  { %v3949_v26 = vpop.f32.mrf.mxu0 }
  0xd9   :  { %v198_v27 = vpop.f32.mrf.mxu0 }
  0xda   :  { %v199_v54 = vadd.f32 %v3513_v43, %v198_v27 }
  0xdb   :  { %v3952_v28 = vpop.f32.mrf.mxu0 }
  0xdc   :  { %v3546_v28 = vld [vmem:[%s5518_s3 + $0x30] sm:$0xff] }
  0xdd   :  { %v203_v29 = vpop.f32.mrf.mxu0 }
  0xde   :  { %v204_v53 = vadd.f32 %v3513_v43, %v203_v29  ;;  %v3547_v29 = vld [vmem:[%s5518_s3 + $0x38] sm:$0xff] }
  0xdf   :  { %v3955_v30 = vpop.f32.mrf.mxu0 }
  0xe0   :  { %v3548_v30 = vld [vmem:[%s5518_s3 + $0x40] sm:$0x3] }
  0xe1   :  { %v208_v31 = vpop.f32.mrf.mxu0 }
  0xe2   :  { %v209_v52 = vadd.f32 %v3513_v43, %v208_v31  ;;  %v3553_v31 = vld [vmem:[%s5516_s4 + $0x10] sm:$0xff] }
  0xe3   :  { %v3958_v32 = vpop.f32.mrf.mxu0 }
  0xe5   :  { %v213_v33 = vpop.f32.mrf.mxu0 }
  0xe6   :  { %v214_v51 = vadd.f32 %v3513_v43, %v213_v33 }
  0xe7   :  { %v3961_v34 = vpop.f32.mrf.mxu0 }
  0xe9   :  { %v218_v35 = vpop.f32.mrf.mxu0 }
  0xea   :  { %v219_v50 = vadd.f32 %v3513_v43, %v218_v35 }
  0xeb   :  { %v3964_v36 = vpop.f32.mrf.mxu0 }
  0xed   :  { %v223_v37 = vpop.f32.mrf.mxu0 }
  0xee   :  { %v224_v49 = vadd.f32 %v3513_v43, %v223_v37 }
  0xef   :  { %v3967_v38 = vpop.f32.mrf.mxu0 }
  0xf1   :  { %v228_v39 = vpop.f32.mrf.mxu0 }
  0xf2   :  { %v229_v48 = vadd.f32 %v3513_v43, %v228_v39 }
  0xf3   :  { %v3970_v40 = vpop.f32.mrf.mxu0 }
  0xf5   :  { %v233_v41 = vpop.f32.mrf.mxu0 }
  0xf6   :  { %v234_v45 = vadd.f32 %v3513_v43, %v233_v41 }
  0xf7   :  { %v3973_v42 = vpop.f32.mrf.mxu0 }
  0xf9   :  { %v238_v44 = vpop.f32.mrf.mxu0 }
  0xfa   :  { %v239_v46 = vadd.f32 %v3513_v43, %v238_v44 }
  0xfb   :  { %v3976_v47 = vpop.f32.mrf.mxu0 }
  0xfc   :  { %4535 = vtanh.f32 %v239_v46 }
  0xfd   :  { %4537 = vtanh.f32 %v234_v45 }
  0xfe   :  { %4539 = vtanh.f32 %v229_v48 }
  0xff   :  { %4541 = vtanh.f32 %v224_v49 }
 0x100   :  { %4543 = vtanh.f32 %v219_v50 }
 0x101   :  { %4545 = vtanh.f32 %v214_v51 }
 0x102   :  { %4547 = vtanh.f32 %v209_v52 }
 0x103   :  { %4549 = vtanh.f32 %v204_v53  ;;  %v3557_v53 = vld [vmem:[%s5518_s3 + $0x48] sm:$0xff] }
 0x104   :  { %4551 = vtanh.f32 %v199_v54  ;;  %v3558_v54 = vld [vmem:[%s5518_s3 + $0x50] sm:$0xff] }
 0x105   :  { %4553 = vtanh.f32 %v194_v56  ;;  %v3559_v56 = vld [vmem:[%s5518_s3 + $0x58] sm:$0x3] }
 0x106   :  { %4555 = vtanh.f32 %v189_v58  ;;  %v3564_v58 = vld [vmem:[%s5516_s4 + $0x18] sm:$0xff] }
 0x107   :  { %4557 = vtanh.f32 %v184_v60 }
 0x108   :  { %4559 = vtanh.f32 %v179_v62 }
 0x109   :  { %v4750_v55 = vpop.eup %4535 }
 0x10a   :  { %3978 = vmatpush3.msk.msra.mxu1 %vm268_vm3, %v4750_v55  ;;  %v4754_v57 = vpop.eup %4537 }
 0x10b   :  { %3979 = vmatprep.subr.mxu1 %v4571_v0  ;;  %v4758_v59 = vpop.eup %4539 }
 0x10c   :  { %3980 = vmatpush3.msra.mxu1 %v4754_v57  ;;  %v4762_v61 = vpop.eup %4541 }
 0x10d   :  { %3981 = vmatprep.subr.mxu1 %v4571_v0  ;;  %v4766_v63 = vpop.eup %4543 }
 0x10e   :  { %3982 = vmatpush3.msra.mxu1 %v4758_v59  ;;  %v4770_v1 = vpop.eup %4545 }
 0x10f   :  { %3983 = vmatprep.subr.mxu1 %v4571_v0  ;;  %v4774_v2 = vpop.eup %4547 }
 0x110   :  { %3984 = vmatpush3.msra.mxu1 %v4762_v61  ;;  %v4778_v3 = vpop.eup %4549 }
 0x111   :  { %3985 = vmatprep.subr.mxu1 %v4571_v0  ;;  %v4782_v4 = vpop.eup %4551 }
 0x112   :  { %3986 = vmatpush3.msra.mxu1 %v4766_v63  ;;  %v4786_v5 = vpop.eup %4553 }
 0x113   :  { %3987 = vmatprep.subr.mxu1 %v4571_v0  ;;  %v4790_v6 = vpop.eup %4555 }
 0x114   :  { %3988 = vmatpush3.msra.mxu1 %v4770_v1  ;;  %v4794_v7 = vpop.eup %4557 }
 0x115   :  { %3989 = vmatprep.subr.mxu1 %v4571_v0  ;;  %v4801_v9 = vpop.eup %4559 }
 0x116   :  { %3990 = vmatpush3.msra.mxu1 %v4774_v2 }
 0x117   :  { %3991 = vmatprep.subr.mxu1 %v4571_v0 }
 0x118   :  { %3992 = vmatpush3.msra.mxu1 %v4778_v3 }
 0x119   :  { %3993 = vmatprep.subr.mxu1 %v4571_v0 }
 0x11a   :  { %3994 = vmatpush3.msra.mxu1 %v4782_v4 }
 0x11b   :  { %3995 = vmatprep.subr.mxu1 %v4571_v0 }
 0x11c   :  { %3996 = vmatpush3.msra.mxu1 %v4786_v5 }
 0x11d   :  { %3997 = vmatprep.subr.mxu1 %v4571_v0 }
 0x11e   :  { %3998 = vmatpush3.msra.mxu1 %v4790_v6 }
 0x11f   :  { %3999 = vmatprep.subr.mxu1 %v4571_v0 }
 0x120   :  { %4000 = vmatpush3.msra.mxu1 %v4794_v7 }
 0x121   :  { %4001 = vmatprep.subr.mxu1 %v4571_v0 }
 0x122   :  { %4002 = vmatpush3.msra.mxu1 %v4801_v9 }
 0x123   :  { %4004 = vmatmul.mubr.msk.f32.vlgmr.msra.gmra.mxu1 %vm258_vm4, %v255_v8  ;;  %4012 = vmatprep.subr.mxu1 %v4571_v0 }
 0x124   :  { %4013 = vmatpush3.msk.msra.mxu1 %vm268_vm3, %v4750_v55  ;;  %4006 = vmatprep.mubr.msk.f32.mxu1 %vm4572_vm1, %v4571_v0 }
 0x125   :  { %4014 = vmatprep.subr.mxu1 %v4571_v0 }
 0x126   :  { %4015 = vmatpush3.msra.mxu1 %v4754_v57 }
 0x127   :  { %4016 = vmatprep.subr.mxu1 %v4571_v0  ;;  %4007 = vmatmul.mubr.msk.f32.gmra.mxu1 %vm258_vm4, %v256_v10 }
 0x128   :  { %4017 = vmatpush3.msra.mxu1 %v4758_v59  ;;  %4009 = vmatprep.mubr.msk.f32.mxu1 %vm4572_vm1, %v4571_v0 }
 0x129   :  { %4018 = vmatprep.subr.mxu1 %v4571_v0 }
 0x12a   :  { %4019 = vmatpush3.msra.mxu1 %v4762_v61 }
 0x12b   :  { %4020 = vmatprep.subr.mxu1 %v4571_v0  ;;  %4010 = vmatmul.mubr.msk.f32.gmra.mxu1 %vm258_vm4, %v257_v11 }
 0x12c   :  { %4021 = vmatpush3.msra.mxu1 %v4766_v63  ;;  %4038 = vmatprep.mubr.msk.f32.mxu1 %vm4572_vm1, %v4571_v0 }
 0x12d   :  { %4022 = vmatprep.subr.mxu1 %v4571_v0 }
 0x12e   :  { %4023 = vmatpush3.msra.mxu1 %v4770_v1 }
 0x12f   :  { %4024 = vmatprep.subr.mxu1 %v4571_v0 }
 0x130   :  { %4025 = vmatpush3.msra.mxu1 %v4774_v2 }
 0x131   :  { %4026 = vmatprep.subr.mxu1 %v4571_v0 }
 0x132   :  { %4027 = vmatpush3.msra.mxu1 %v4778_v3 }
 0x133   :  { %4028 = vmatprep.subr.mxu1 %v4571_v0 }
 0x134   :  { %4029 = vmatpush3.msra.mxu1 %v4782_v4 }
 0x135   :  { %4030 = vmatprep.subr.mxu1 %v4571_v0 }
 0x136   :  { %4031 = vmatpush3.msra.mxu1 %v4786_v5 }
 0x137   :  { %4032 = vmatprep.subr.mxu1 %v4571_v0 }
 0x138   :  { %4033 = vmatpush3.msra.mxu1 %v4790_v6 }
 0x139   :  { %4034 = vmatprep.subr.mxu1 %v4571_v0 }
 0x13a   :  { %4035 = vmatpush3.msra.mxu1 %v4794_v7 }
 0x13b   :  { %4036 = vmatprep.subr.mxu1 %v4571_v0 }
 0x13c   :  { %4037 = vmatpush3.msra.mxu1 %v4801_v9 }
 0x13d   :  { %4039 = vmatmul.mubr.msk.f32.vlgmr.msra.gmra.mxu1 %vm258_vm4, %v3532_v12  ;;  %4058 = vmatprep.subr.mxu1 %v4571_v0 }
 0x13e   :  { %4041 = vmatprep.mubr.msk.f32.mxu1 %vm4572_vm1, %v4571_v0  ;;  %4059 = vmatpush3.msra.mxu1 %v352_v15 }
 0x13f   :  { %4104 = vmatprep.subr.mxu1 %v4571_v0 }
 0x141   :  { %4042 = vmatmul.mubr.msk.f32.gmra.mxu1 %vm258_vm4, %v3533_v13 }
 0x142   :  { %4044 = vmatprep.mubr.msk.f32.mxu1 %vm4572_vm1, %v4571_v0 }
 0x145   :  { %4045 = vmatmul.mubr.msk.f32.gmra.mxu1 %vm258_vm4, %v3534_v14 }
 0x146   :  { %4060 = vmatprep.mubr.msk.f32.mxu1 %vm4572_vm1, %v4571_v0 }
 0x1e3   :  { %v338_v16 = vpop.f32.mrf.mxu1 }
 0x1e4   :  { %4061 = vmatmul.mubr.msk.f32.vlgmr.msra.gmra.mxu1 %vm448_vm5, %v338_v16 }
 0x1e5   :  { %v4005_v17 = vpop.f32.mrf.mxu1  ;;  %4063 = vmatprep.mubr.msk.f32.mxu1 %vm4572_vm1, %v4571_v0  ;;  %4105 = vmatpush3.msra.mxu1 %v3553_v31 }
 0x1e6   :  { %4115 = vmatprep.subr.mxu1 %v4571_v0 }
 0x1e7   :  { %v343_v18 = vpop.f32.mrf.mxu1 }
 0x1e8   :  { %4064 = vmatmul.mubr.msk.f32.gmra.mxu1 %vm448_vm5, %v343_v18 }
 0x1e9   :  { %v4008_v19 = vpop.f32.mrf.mxu1  ;;  %4066 = vmatprep.mubr.msk.f32.mxu1 %vm4572_vm1, %v4571_v0 }
 0x1eb   :  { %v348_v20 = vpop.f32.mrf.mxu1 }
 0x1ec   :  { %4067 = vmatmul.mubr.msk.f32.gmra.mxu1 %vm448_vm5, %v348_v20 }
 0x1ed   :  { %v4011_v21 = vpop.f32.mrf.mxu1  ;;  %4106 = vmatprep.mubr.msk.f32.mxu1 %vm4572_vm1, %v4571_v0 }
 0x1fd   :  { %v432_v22 = vpop.f32.mrf.mxu1 }
 0x1fe   :  { %4050 = vmatmul.mubr.msk.f32.vlgmr.msra.gmra.mxu0 %vm448_vm5, %v432_v22  ;;  %v3568_v22 = vld [vmem:[%s5518_s3 + $0x60] sm:$0xff] }
 0x1ff   :  { %4070 = vmatpush3.msk.msra.mxu0 %vm268_vm3, %v4750_v55  ;;  %v4040_v23 = vpop.f32.mrf.mxu1  ;;  %4052 = vmatprep.mubr.msk.f32.mxu0 %vm4572_vm1, %v4571_v0 }
 0x200   :  { %4071 = vmatprep.subr.mxu0 %v4571_v0  ;;  %v3569_v23 = vld [vmem:[%s5518_s3 + $0x68] sm:$0xff] }
 0x201   :  { %4072 = vmatpush3.msra.mxu0 %v4754_v57  ;;  %v437_v24 = vpop.f32.mrf.mxu1 }
 0x202   :  { %4073 = vmatprep.subr.mxu0 %v4571_v0  ;;  %4053 = vmatmul.mubr.msk.f32.gmra.mxu0 %vm448_vm5, %v437_v24  ;;  %v3570_v24 = vld [vmem:[%s5518_s3 + $0x70] sm:$0x3] }
 0x203   :  { %4074 = vmatpush3.msra.mxu0 %v4758_v59  ;;  %v4043_v25 = vpop.f32.mrf.mxu1  ;;  %4055 = vmatprep.mubr.msk.f32.mxu0 %vm4572_vm1, %v4571_v0 }
 0x204   :  { %4075 = vmatprep.subr.mxu0 %v4571_v0  ;;  %v3575_v25 = vld [vmem:[%s5516_s4 + $0x20] sm:$0xff] }
 0x205   :  { %4076 = vmatpush3.msra.mxu0 %v4762_v61  ;;  %v442_v26 = vpop.f32.mrf.mxu1 }
 0x206   :  { %4077 = vmatprep.subr.mxu0 %v4571_v0  ;;  %4056 = vmatmul.mubr.msk.f32.gmra.mxu0 %vm448_vm5, %v442_v26 }
 0x207   :  { %4078 = vmatpush3.msra.mxu0 %v4766_v63  ;;  %v4046_v27 = vpop.f32.mrf.mxu1  ;;  %4095 = vmatprep.mubr.msk.f32.mxu0 %vm4572_vm1, %v4571_v0 }
 0x208   :  { %4079 = vmatprep.subr.mxu0 %v4571_v0 }
 0x209   :  { %4080 = vmatpush3.msra.mxu0 %v4770_v1 }
 0x20a   :  { %4081 = vmatprep.subr.mxu0 %v4571_v0 }
 0x20b   :  { %4082 = vmatpush3.msra.mxu0 %v4774_v2 }
 0x20c   :  { %4083 = vmatprep.subr.mxu0 %v4571_v0 }
 0x20d   :  { %4084 = vmatpush3.msra.mxu0 %v4778_v3 }
 0x20e   :  { %4085 = vmatprep.subr.mxu0 %v4571_v0 }
 0x20f   :  { %4086 = vmatpush3.msra.mxu0 %v4782_v4 }
 0x210   :  { %4087 = vmatprep.subr.mxu0 %v4571_v0 }
 0x211   :  { %4088 = vmatpush3.msra.mxu0 %v4786_v5 }
 0x212   :  { %4089 = vmatprep.subr.mxu0 %v4571_v0 }
 0x213   :  { %4090 = vmatpush3.msra.mxu0 %v4790_v6 }
 0x214   :  { %4091 = vmatprep.subr.mxu0 %v4571_v0 }
 0x215   :  { %4092 = vmatpush3.msra.mxu0 %v4794_v7 }
 0x216   :  { %4093 = vmatprep.subr.mxu0 %v4571_v0 }
 0x217   :  { %4094 = vmatpush3.msra.mxu0 %v4801_v9 }
 0x218   :  { %4096 = vmatmul.mubr.msk.f32.vlgmr.msra.gmra.mxu0 %vm258_vm4, %v3546_v28  ;;  %4150 = vmatprep.subr.mxu0 %v4571_v0 }
 0x219   :  { %4098 = vmatprep.mubr.msk.f32.mxu0 %vm4572_vm1, %v4571_v0  ;;  %4151 = vmatpush3.msra.mxu0 %v3564_v58 }
 0x21a   :  { %4161 = vmatprep.subr.mxu0 %v4571_v0 }
 0x21c   :  { %4099 = vmatmul.mubr.msk.f32.gmra.mxu0 %vm258_vm4, %v3547_v29 }
 0x21d   :  { %4101 = vmatprep.mubr.msk.f32.mxu0 %vm4572_vm1, %v4571_v0 }
 0x220   :  { %4102 = vmatmul.mubr.msk.f32.gmra.mxu0 %vm258_vm4, %v3548_v30 }
 0x221   :  { %4152 = vmatprep.mubr.msk.f32.mxu0 %vm4572_vm1, %v4571_v0 }
 0x2a4   :  { %v613_v32 = vpop.f32.mrf.mxu1 }
 0x2a6   :  { %v4062_v33 = vpop.f32.mrf.mxu1 }
 0x2a8   :  { %v618_v34 = vpop.f32.mrf.mxu1 }
 0x2aa   :  { %v4065_v35 = vpop.f32.mrf.mxu1 }
 0x2ac   :  { %v623_v36 = vpop.f32.mrf.mxu1 }
 0x2ae   :  { %v4068_v37 = vpop.f32.mrf.mxu1 }
 0x2be   :  { %v524_v38 = vpop.f32.mrf.mxu0 }
 0x2bf   :  { %v614_v39 = vadd.f32 %v613_v32, %v524_v38 }
 0x2c0   :  { %v4051_v40 = vpop.f32.mrf.mxu0 }
 0x2c2   :  { %v529_v41 = vpop.f32.mrf.mxu0 }
 0x2c3   :  { %v619_v42 = vadd.f32 %v618_v34, %v529_v41  ;;  %v3579_v41 = vld [vmem:[%s5518_s3 + $0x78] sm:$0xff] }
 0x2c4   :  { %v4054_v43 = vpop.f32.mrf.mxu0 }
 0x2c5   :  { %v3581_v43 = vld [vmem:[%s5518_s3 + $0x88] sm:$0x3] }
 0x2c6   :  { %v534_v44 = vpop.f32.mrf.mxu0 }
 0x2c7   :  { %v624_v45 = vadd.f32 %v623_v36, %v534_v44  ;;  %v3586_v44 = vld [vmem:[%s5516_s4 + $0x28] sm:$0xff] }
 0x2c8   :  { %v4057_v46 = vpop.f32.mrf.mxu0 }
 0x2d8   :  { %v706_v47 = vpop.f32.mrf.mxu0 }
 0x2d9   :  { %4107 = vmatmul.mubr.msk.f32.vlgmr.msra.gmra.mxu1 %vm448_vm5, %v706_v47 }
 0x2da   :  { %4116 = vmatpush3.msk.msra.mxu1 %vm268_vm3, %v4750_v55  ;;  %v4097_v48 = vpop.f32.mrf.mxu0  ;;  %4109 = vmatprep.mubr.msk.f32.mxu1 %vm4572_vm1, %v4571_v0 }
 0x2db   :  { %4117 = vmatprep.subr.mxu1 %v4571_v0 }
 0x2dc   :  { %4118 = vmatpush3.msra.mxu1 %v4754_v57  ;;  %v711_v49 = vpop.f32.mrf.mxu0 }
 0x2dd   :  { %4119 = vmatprep.subr.mxu1 %v4571_v0  ;;  %4110 = vmatmul.mubr.msk.f32.gmra.mxu1 %vm448_vm5, %v711_v49 }
 0x2de   :  { %4120 = vmatpush3.msra.mxu1 %v4758_v59  ;;  %v4100_v50 = vpop.f32.mrf.mxu0  ;;  %4112 = vmatprep.mubr.msk.f32.mxu1 %vm4572_vm1, %v4571_v0 }
 0x2df   :  { %4121 = vmatprep.subr.mxu1 %v4571_v0 }
 0x2e0   :  { %4122 = vmatpush3.msra.mxu1 %v4762_v61  ;;  %v716_v51 = vpop.f32.mrf.mxu0 }
 0x2e1   :  { %4123 = vmatprep.subr.mxu1 %v4571_v0  ;;  %4113 = vmatmul.mubr.msk.f32.gmra.mxu1 %vm448_vm5, %v716_v51 }
 0x2e2   :  { %4124 = vmatpush3.msra.mxu1 %v4766_v63  ;;  %v4103_v52 = vpop.f32.mrf.mxu0  ;;  %4141 = vmatprep.mubr.msk.f32.mxu1 %vm4572_vm1, %v4571_v0 }
 0x2e3   :  { %4125 = vmatprep.subr.mxu1 %v4571_v0 }
 0x2e4   :  { %4126 = vmatpush3.msra.mxu1 %v4770_v1 }
 0x2e5   :  { %4127 = vmatprep.subr.mxu1 %v4571_v0 }
 0x2e6   :  { %4128 = vmatpush3.msra.mxu1 %v4774_v2 }
 0x2e7   :  { %4129 = vmatprep.subr.mxu1 %v4571_v0 }
 0x2e8   :  { %4130 = vmatpush3.msra.mxu1 %v4778_v3 }
 0x2e9   :  { %4131 = vmatprep.subr.mxu1 %v4571_v0 }
 0x2ea   :  { %4132 = vmatpush3.msra.mxu1 %v4782_v4 }
 0x2eb   :  { %4133 = vmatprep.subr.mxu1 %v4571_v0 }
 0x2ec   :  { %4134 = vmatpush3.msra.mxu1 %v4786_v5 }
 0x2ed   :  { %4135 = vmatprep.subr.mxu1 %v4571_v0 }
 0x2ee   :  { %4136 = vmatpush3.msra.mxu1 %v4790_v6 }
 0x2ef   :  { %4137 = vmatprep.subr.mxu1 %v4571_v0 }
 0x2f0   :  { %4138 = vmatpush3.msra.mxu1 %v4794_v7 }
 0x2f1   :  { %4139 = vmatprep.subr.mxu1 %v4571_v0 }
 0x2f2   :  { %4140 = vmatpush3.msra.mxu1 %v4801_v9 }
 0x2f3   :  { %4142 = vmatmul.mubr.msk.f32.vlgmr.msra.gmra.mxu1 %vm258_vm4, %v3557_v53  ;;  %4196 = vmatprep.subr.mxu1 %v4571_v0 }
 0x2f4   :  { %4144 = vmatprep.mubr.msk.f32.mxu1 %vm4572_vm1, %v4571_v0  ;;  %4197 = vmatpush3.msra.mxu1 %v3575_v25 }
 0x2f5   :  { %4207 = vmatprep.subr.mxu1 %v4571_v0 }
 0x2f7   :  { %4145 = vmatmul.mubr.msk.f32.gmra.mxu1 %vm258_vm4, %v3558_v54 }
 0x2f8   :  { %4147 = vmatprep.mubr.msk.f32.mxu1 %vm4572_vm1, %v4571_v0 }
 0x2fb   :  { %4148 = vmatmul.mubr.msk.f32.gmra.mxu1 %vm258_vm4, %v3559_v56 }
 0x2fc   :  { %4198 = vmatprep.mubr.msk.f32.mxu1 %vm4572_vm1, %v4571_v0 }
 0x399   :  { %v797_v60 = vpop.f32.mrf.mxu1 }
 0x39a   :  { %v811_v62 = vadd.f32 %v797_v60, %v614_v39 }
 0x39b   :  { %v4108_v8 = vpop.f32.mrf.mxu1 }
 0x39d   :  { %v802_v10 = vpop.f32.mrf.mxu1 }
 0x39e   :  { %v812_v11 = vadd.f32 %v802_v10, %v619_v42  ;;  %v3580_v42 = vld [vmem:[%s5518_s3 + $0x80] sm:$0xff]  ;;  %v3590_v10 = vld [vmem:[%s5518_s3 + $0x90] sm:$0xff] }
 0x39f   :  { %v4111_v12 = vpop.f32.mrf.mxu1 }
 0x3a0   :  { %v3592_v12 = vld [vmem:[%s5518_s3 + $0xa0] sm:$0x3] }
 0x3a1   :  { %v807_v13 = vpop.f32.mrf.mxu1 }
 0x3a2   :  { %v813_v14 = vadd.f32 %v807_v13, %v624_v45  ;;  %v3597_v13 = vld [vmem:[%s5516_s4 + $0x30] sm:$0xff] }
 0x3a3   :  { %v4114_v15 = vpop.f32.mrf.mxu1 }
 0x3b3   :  { %v893_v16 = vpop.f32.mrf.mxu1 }
 0x3b4   :  { %4153 = vmatmul.mubr.msk.f32.vlgmr.msra.gmra.mxu0 %vm448_vm5, %v893_v16 }
 0x3b5   :  { %4162 = vmatpush3.msk.msra.mxu0 %vm268_vm3, %v4750_v55  ;;  %v4143_v17 = vpop.f32.mrf.mxu1  ;;  %4155 = vmatprep.mubr.msk.f32.mxu0 %vm4572_vm1, %v4571_v0 }
 0x3b6   :  { %4163 = vmatprep.subr.mxu0 %v4571_v0 }
 0x3b7   :  { %4164 = vmatpush3.msra.mxu0 %v4754_v57  ;;  %v898_v18 = vpop.f32.mrf.mxu1 }
 0x3b8   :  { %4165 = vmatprep.subr.mxu0 %v4571_v0  ;;  %4156 = vmatmul.mubr.msk.f32.gmra.mxu0 %vm448_vm5, %v898_v18 }
 0x3b9   :  { %4166 = vmatpush3.msra.mxu0 %v4758_v59  ;;  %v4146_v19 = vpop.f32.mrf.mxu1  ;;  %4158 = vmatprep.mubr.msk.f32.mxu0 %vm4572_vm1, %v4571_v0 }
 0x3ba   :  { %4167 = vmatprep.subr.mxu0 %v4571_v0 }
 0x3bb   :  { %4168 = vmatpush3.msra.mxu0 %v4762_v61  ;;  %v903_v20 = vpop.f32.mrf.mxu1 }
 0x3bc   :  { %4169 = vmatprep.subr.mxu0 %v4571_v0  ;;  %4159 = vmatmul.mubr.msk.f32.gmra.mxu0 %vm448_vm5, %v903_v20 }
 0x3bd   :  { %4170 = vmatpush3.msra.mxu0 %v4766_v63  ;;  %v4149_v21 = vpop.f32.mrf.mxu1  ;;  %4187 = vmatprep.mubr.msk.f32.mxu0 %vm4572_vm1, %v4571_v0 }
 0x3be   :  { %4171 = vmatprep.subr.mxu0 %v4571_v0 }
 0x3bf   :  { %4172 = vmatpush3.msra.mxu0 %v4770_v1 }
 0x3c0   :  { %4173 = vmatprep.subr.mxu0 %v4571_v0 }
 0x3c1   :  { %4174 = vmatpush3.msra.mxu0 %v4774_v2 }
 0x3c2   :  { %4175 = vmatprep.subr.mxu0 %v4571_v0 }
 0x3c3   :  { %4176 = vmatpush3.msra.mxu0 %v4778_v3 }
 0x3c4   :  { %4177 = vmatprep.subr.mxu0 %v4571_v0 }
 0x3c5   :  { %4178 = vmatpush3.msra.mxu0 %v4782_v4 }
 0x3c6   :  { %4179 = vmatprep.subr.mxu0 %v4571_v0 }
 0x3c7   :  { %4180 = vmatpush3.msra.mxu0 %v4786_v5 }
 0x3c8   :  { %4181 = vmatprep.subr.mxu0 %v4571_v0 }
 0x3c9   :  { %4182 = vmatpush3.msra.mxu0 %v4790_v6 }
 0x3ca   :  { %4183 = vmatprep.subr.mxu0 %v4571_v0 }
 0x3cb   :  { %4184 = vmatpush3.msra.mxu0 %v4794_v7 }
 0x3cc   :  { %4185 = vmatprep.subr.mxu0 %v4571_v0 }
 0x3cd   :  { %4186 = vmatpush3.msra.mxu0 %v4801_v9 }
 0x3ce   :  { %4188 = vmatmul.mubr.msk.f32.vlgmr.msra.gmra.mxu0 %vm258_vm4, %v3568_v22  ;;  %4242 = vmatprep.subr.mxu0 %v4571_v0 }
 0x3cf   :  { %4190 = vmatprep.mubr.msk.f32.mxu0 %vm4572_vm1, %v4571_v0  ;;  %4243 = vmatpush3.msra.mxu0 %v3586_v44 }
 0x3d0   :  { %4253 = vmatprep.subr.mxu0 %v4571_v0 }
 0x3d2   :  { %4191 = vmatmul.mubr.msk.f32.gmra.mxu0 %vm258_vm4, %v3569_v23 }
 0x3d3   :  { %4193 = vmatprep.mubr.msk.f32.mxu0 %vm4572_vm1, %v4571_v0 }
 0x3d6   :  { %4194 = vmatmul.mubr.msk.f32.gmra.mxu0 %vm258_vm4, %v3570_v24 }
 0x3d7   :  { %4244 = vmatprep.mubr.msk.f32.mxu0 %vm4572_vm1, %v4571_v0 }
 0x474   :  { %v984_v26 = vpop.f32.mrf.mxu0 }
 0x475   :  { %v998_v27 = vadd.f32 %v984_v26, %v811_v62 }
 0x476   :  { %v4154_v28 = vpop.f32.mrf.mxu0 }
 0x478   :  { %v989_v29 = vpop.f32.mrf.mxu0 }
 0x479   :  { %v999_v30 = vadd.f32 %v989_v29, %v812_v11  ;;  %v3591_v11 = vld [vmem:[%s5518_s3 + $0x98] sm:$0xff]  ;;  %v3601_v29 = vld [vmem:[%s5518_s3 + $0xa8] sm:$0xff] }
 0x47a   :  { %v4157_v31 = vpop.f32.mrf.mxu0 }
 0x47b   :  { %v3603_v31 = vld [vmem:[%s5518_s3 + $0xb8] sm:$0x3] }
 0x47c   :  { %v994_v32 = vpop.f32.mrf.mxu0 }
 0x47d   :  { %v1000_v33 = vadd.f32 %v994_v32, %v813_v14  ;;  %v3608_v32 = vld [vmem:[%s5516_s4 + $0x38] sm:$0xff] }
 0x47e   :  { %v4160_v34 = vpop.f32.mrf.mxu0 }
 0x48e   :  { %v1080_v35 = vpop.f32.mrf.mxu0 }
 0x48f   :  { %4199 = vmatmul.mubr.msk.f32.vlgmr.msra.gmra.mxu1 %vm448_vm5, %v1080_v35 }
 0x490   :  { %4208 = vmatpush3.msk.msra.mxu1 %vm268_vm3, %v4750_v55  ;;  %v4189_v36 = vpop.f32.mrf.mxu0  ;;  %4201 = vmatprep.mubr.msk.f32.mxu1 %vm4572_vm1, %v4571_v0 }
 0x491   :  { %4209 = vmatprep.subr.mxu1 %v4571_v0 }
 0x492   :  { %4210 = vmatpush3.msra.mxu1 %v4754_v57  ;;  %v1085_v37 = vpop.f32.mrf.mxu0 }
 0x493   :  { %4211 = vmatprep.subr.mxu1 %v4571_v0  ;;  %4202 = vmatmul.mubr.msk.f32.gmra.mxu1 %vm448_vm5, %v1085_v37 }
 0x494   :  { %4212 = vmatpush3.msra.mxu1 %v4758_v59  ;;  %v4192_v38 = vpop.f32.mrf.mxu0  ;;  %4204 = vmatprep.mubr.msk.f32.mxu1 %vm4572_vm1, %v4571_v0 }
 0x495   :  { %4213 = vmatprep.subr.mxu1 %v4571_v0 }
 0x496   :  { %4214 = vmatpush3.msra.mxu1 %v4762_v61  ;;  %v1090_v39 = vpop.f32.mrf.mxu0 }
 0x497   :  { %4215 = vmatprep.subr.mxu1 %v4571_v0  ;;  %4205 = vmatmul.mubr.msk.f32.gmra.mxu1 %vm448_vm5, %v1090_v39 }
 0x498   :  { %4216 = vmatpush3.msra.mxu1 %v4766_v63  ;;  %v4195_v40 = vpop.f32.mrf.mxu0  ;;  %4233 = vmatprep.mubr.msk.f32.mxu1 %vm4572_vm1, %v4571_v0 }
 0x499   :  { %4217 = vmatprep.subr.mxu1 %v4571_v0 }
 0x49a   :  { %4218 = vmatpush3.msra.mxu1 %v4770_v1 }
 0x49b   :  { %4219 = vmatprep.subr.mxu1 %v4571_v0 }
 0x49c   :  { %4220 = vmatpush3.msra.mxu1 %v4774_v2 }
 0x49d   :  { %4221 = vmatprep.subr.mxu1 %v4571_v0 }
 0x49e   :  { %4222 = vmatpush3.msra.mxu1 %v4778_v3 }
 0x49f   :  { %4223 = vmatprep.subr.mxu1 %v4571_v0 }
 0x4a0   :  { %4224 = vmatpush3.msra.mxu1 %v4782_v4 }
 0x4a1   :  { %4225 = vmatprep.subr.mxu1 %v4571_v0 }
 0x4a2   :  { %4226 = vmatpush3.msra.mxu1 %v4786_v5 }
 0x4a3   :  { %4227 = vmatprep.subr.mxu1 %v4571_v0 }
 0x4a4   :  { %4228 = vmatpush3.msra.mxu1 %v4790_v6 }
 0x4a5   :  { %4229 = vmatprep.subr.mxu1 %v4571_v0 }
 0x4a6   :  { %4230 = vmatpush3.msra.mxu1 %v4794_v7 }
 0x4a7   :  { %4231 = vmatprep.subr.mxu1 %v4571_v0 }
 0x4a8   :  { %4232 = vmatpush3.msra.mxu1 %v4801_v9 }
 0x4a9   :  { %4234 = vmatmul.mubr.msk.f32.vlgmr.msra.gmra.mxu1 %vm258_vm4, %v3579_v41  ;;  %4288 = vmatprep.subr.mxu1 %v4571_v0 }
 0x4aa   :  { %4236 = vmatprep.mubr.msk.f32.mxu1 %vm4572_vm1, %v4571_v0  ;;  %4289 = vmatpush3.msra.mxu1 %v3597_v13 }
 0x4ab   :  { %4299 = vmatprep.subr.mxu1 %v4571_v0 }
 0x4ad   :  { %4237 = vmatmul.mubr.msk.f32.gmra.mxu1 %vm258_vm4, %v3580_v42 }
 0x4ae   :  { %4239 = vmatprep.mubr.msk.f32.mxu1 %vm4572_vm1, %v4571_v0 }
 0x4b1   :  { %4240 = vmatmul.mubr.msk.f32.gmra.mxu1 %vm258_vm4, %v3581_v43 }
 0x4b2   :  { %4290 = vmatprep.mubr.msk.f32.mxu1 %vm4572_vm1, %v4571_v0 }
 0x54f   :  { %v1171_v45 = vpop.f32.mrf.mxu1 }
 0x550   :  { %v1185_v46 = vadd.f32 %v1171_v45, %v998_v27 }
 0x551   :  { %v4200_v47 = vpop.f32.mrf.mxu1 }
 0x553   :  { %v1176_v48 = vpop.f32.mrf.mxu1 }
 0x554   :  { %v1186_v49 = vadd.f32 %v1176_v48, %v999_v30  ;;  %v3602_v30 = vld [vmem:[%s5518_s3 + $0xb0] sm:$0xff] }
 0x555   :  { %v4203_v50 = vpop.f32.mrf.mxu1 }
 0x557   :  { %v1181_v51 = vpop.f32.mrf.mxu1 }
 0x558   :  { %v1187_v52 = vadd.f32 %v1181_v51, %v1000_v33 }
 0x559   :  { %v4206_v53 = vpop.f32.mrf.mxu1 }
 0x569   :  { %v1267_v54 = vpop.f32.mrf.mxu1 }
 0x56a   :  { %4245 = vmatmul.mubr.msk.f32.vlgmr.msra.gmra.mxu0 %vm448_vm5, %v1267_v54 }
 0x56b   :  { %4254 = vmatpush3.msk.msra.mxu0 %vm268_vm3, %v4750_v55  ;;  %v4235_v56 = vpop.f32.mrf.mxu1  ;;  %4247 = vmatprep.mubr.msk.f32.mxu0 %vm4572_vm1, %v4571_v0 }
 0x56c   :  { %4255 = vmatprep.subr.mxu0 %v4571_v0 }
 0x56d   :  { %4256 = vmatpush3.msra.mxu0 %v4754_v57  ;;  %v1272_v58 = vpop.f32.mrf.mxu1 }
 0x56e   :  { %4257 = vmatprep.subr.mxu0 %v4571_v0  ;;  %4248 = vmatmul.mubr.msk.f32.gmra.mxu0 %vm448_vm5, %v1272_v58 }
 0x56f   :  { %4258 = vmatpush3.msra.mxu0 %v4758_v59  ;;  %v4238_v60 = vpop.f32.mrf.mxu1  ;;  %4250 = vmatprep.mubr.msk.f32.mxu0 %vm4572_vm1, %v4571_v0 }
 0x570   :  { %4259 = vmatprep.subr.mxu0 %v4571_v0 }
 0x571   :  { %4260 = vmatpush3.msra.mxu0 %v4762_v61  ;;  %v1277_v62 = vpop.f32.mrf.mxu1 }
 0x572   :  { %4261 = vmatprep.subr.mxu0 %v4571_v0  ;;  %4251 = vmatmul.mubr.msk.f32.gmra.mxu0 %vm448_vm5, %v1277_v62 }
 0x573   :  { %4262 = vmatpush3.msra.mxu0 %v4766_v63  ;;  %v4241_v8 = vpop.f32.mrf.mxu1  ;;  %4279 = vmatprep.mubr.msk.f32.mxu0 %vm4572_vm1, %v4571_v0 }
 0x574   :  { %4263 = vmatprep.subr.mxu0 %v4571_v0 }
 0x575   :  { %4264 = vmatpush3.msra.mxu0 %v4770_v1 }
 0x576   :  { %4265 = vmatprep.subr.mxu0 %v4571_v0 }
 0x577   :  { %4266 = vmatpush3.msra.mxu0 %v4774_v2 }
 0x578   :  { %4267 = vmatprep.subr.mxu0 %v4571_v0 }
 0x579   :  { %4268 = vmatpush3.msra.mxu0 %v4778_v3 }
 0x57a   :  { %4269 = vmatprep.subr.mxu0 %v4571_v0 }
 0x57b   :  { %4270 = vmatpush3.msra.mxu0 %v4782_v4 }
 0x57c   :  { %4271 = vmatprep.subr.mxu0 %v4571_v0 }
 0x57d   :  { %4272 = vmatpush3.msra.mxu0 %v4786_v5 }
 0x57e   :  { %4273 = vmatprep.subr.mxu0 %v4571_v0 }
 0x57f   :  { %4274 = vmatpush3.msra.mxu0 %v4790_v6 }
 0x580   :  { %4275 = vmatprep.subr.mxu0 %v4571_v0 }
 0x581   :  { %4276 = vmatpush3.msra.mxu0 %v4794_v7 }
 0x582   :  { %4277 = vmatprep.subr.mxu0 %v4571_v0 }
 0x583   :  { %4278 = vmatpush3.msra.mxu0 %v4801_v9 }
 0x584   :  { %4280 = vmatmul.mubr.msk.f32.vlgmr.msra.gmra.mxu0 %vm258_vm4, %v3590_v10  ;;  %4334 = vmatprep.subr.mxu0 %v4571_v0 }
 0x585   :  { %4282 = vmatprep.mubr.msk.f32.mxu0 %vm4572_vm1, %v4571_v0  ;;  %4335 = vmatpush3.msra.mxu0 %v3608_v32  ;;  %v3637_v32 = vld [vmem:[%s5520_s6 + $0x6] sm:$0x3] }
 0x586   :  { %4345 = vmatprep.subr.mxu0 %v4571_v0 }
 0x588   :  { %4283 = vmatmul.mubr.msk.f32.gmra.mxu0 %vm258_vm4, %v3591_v11 }
 0x589   :  { %4285 = vmatprep.mubr.msk.f32.mxu0 %vm4572_vm1, %v4571_v0 }
 0x58c   :  { %4286 = vmatmul.mubr.msk.f32.gmra.mxu0 %vm258_vm4, %v3592_v12  ;;  %v3623_v12 = vld [vmem:[%s5519_s5] ss:$0 sm:$0xff] }
 0x58d   :  { %4336 = vmatprep.mubr.msk.f32.mxu0 %vm4572_vm1, %v4571_v0 }
 0x62a   :  { %v1358_v14 = vpop.f32.mrf.mxu0 }
 0x62b   :  { %v1372_v15 = vadd.f32 %v1358_v14, %v1185_v46 }
 0x62c   :  { %v4246_v16 = vpop.f32.mrf.mxu0 }
 0x62e   :  { %v1363_v17 = vpop.f32.mrf.mxu0 }
 0x62f   :  { %v1373_v18 = vadd.f32 %v1363_v17, %v1186_v49 }
 0x630   :  { %v4249_v19 = vpop.f32.mrf.mxu0 }
 0x631   :  { %v1949_v19 = vld [vmem:[%s5520_s6] sm:$0x3] }
 0x632   :  { %v1368_v20 = vpop.f32.mrf.mxu0 }
 0x633   :  { %v1374_v21 = vadd.f32 %v1368_v20, %v1187_v52 }
 0x634   :  { %v4252_v22 = vpop.f32.mrf.mxu0 }
 0x635   :  { %v3626_v22 = vld [vmem:[%s5520_s6 + $0x2] sm:$0x3] }
 0x644   :  { %v1454_v23 = vpop.f32.mrf.mxu0 }
 0x645   :  { %4291 = vmatmul.mubr.msk.f32.vlgmr.msra.gmra.mxu1 %vm448_vm5, %v1454_v23  ;;  %v3629_v23 = vld [vmem:[%s5521_s7 + $0x8] sm:$0xff] }
 0x646   :  { %4300 = vmatpush3.msk.msra.mxu1 %vm268_vm3, %v4750_v55  ;;  %v4281_v24 = vpop.f32.mrf.mxu0  ;;  %4293 = vmatprep.mubr.msk.f32.mxu1 %vm4572_vm1, %v4571_v0 }
 0x647   :  { %4301 = vmatprep.subr.mxu1 %v4571_v0 }
 0x648   :  { %4302 = vmatpush3.msra.mxu1 %v4754_v57  ;;  %v1459_v25 = vpop.f32.mrf.mxu0 }
 0x649   :  { %4303 = vmatprep.subr.mxu1 %v4571_v0  ;;  %4294 = vmatmul.mubr.msk.f32.gmra.mxu1 %vm448_vm5, %v1459_v25 }
 0x64a   :  { %4304 = vmatpush3.msra.mxu1 %v4758_v59  ;;  %v4284_v26 = vpop.f32.mrf.mxu0  ;;  %4296 = vmatprep.mubr.msk.f32.mxu1 %vm4572_vm1, %v4571_v0 }
 0x64b   :  { %4305 = vmatprep.subr.mxu1 %v4571_v0 }
 0x64c   :  { %4306 = vmatpush3.msra.mxu1 %v4762_v61  ;;  %v1464_v27 = vpop.f32.mrf.mxu0 }
 0x64d   :  { %4307 = vmatprep.subr.mxu1 %v4571_v0  ;;  %4297 = vmatmul.mubr.msk.f32.gmra.mxu1 %vm448_vm5, %v1464_v27 }
 0x64e   :  { %4308 = vmatpush3.msra.mxu1 %v4766_v63  ;;  %v4287_v28 = vpop.f32.mrf.mxu0  ;;  %4325 = vmatprep.mubr.msk.f32.mxu1 %vm4572_vm1, %v4571_v0 }
 0x64f   :  { %4309 = vmatprep.subr.mxu1 %v4571_v0  ;;  %v2027_v28 = vld [vmem:[%s5521_s7] sm:$0xff] }
 0x650   :  { %4310 = vmatpush3.msra.mxu1 %v4770_v1 }
 0x651   :  { %4311 = vmatprep.subr.mxu1 %v4571_v0 }
 0x652   :  { %4312 = vmatpush3.msra.mxu1 %v4774_v2 }
 0x653   :  { %4313 = vmatprep.subr.mxu1 %v4571_v0 }
 0x654   :  { %4314 = vmatpush3.msra.mxu1 %v4778_v3 }
 0x655   :  { %4315 = vmatprep.subr.mxu1 %v4571_v0 }
 0x656   :  { %4316 = vmatpush3.msra.mxu1 %v4782_v4 }
 0x657   :  { %4317 = vmatprep.subr.mxu1 %v4571_v0 }
 0x658   :  { %4318 = vmatpush3.msra.mxu1 %v4786_v5 }
 0x659   :  { %4319 = vmatprep.subr.mxu1 %v4571_v0 }
 0x65a   :  { %4320 = vmatpush3.msra.mxu1 %v4790_v6 }
 0x65b   :  { %4321 = vmatprep.subr.mxu1 %v4571_v0 }
 0x65c   :  { %4322 = vmatpush3.msra.mxu1 %v4794_v7 }
 0x65d   :  { %4323 = vmatprep.subr.mxu1 %v4571_v0 }
 0x65e   :  { %4324 = vmatpush3.msra.mxu1 %v4801_v9 }
 0x65f   :  { %4326 = vmatmul.mubr.msk.f32.vlgmr.msra.gmra.mxu1 %vm258_vm4, %v3601_v29  ;;  %4380 = vmatprep.subr.mxu1 %v4571_v0 }
 0x660   :  { %4328 = vmatprep.mubr.msk.f32.mxu1 %vm4572_vm1, %v4571_v0 }
 0x663   :  { %4329 = vmatmul.mubr.msk.f32.gmra.mxu1 %vm258_vm4, %v3602_v30 }
 0x664   :  { %4331 = vmatprep.mubr.msk.f32.mxu1 %vm4572_vm1, %v4571_v0 }
 0x667   :  { %4332 = vmatmul.mubr.msk.f32.gmra.mxu1 %vm258_vm4, %v3603_v31  ;;  %v3635_v31 = vld [vmem:[%s5521_s7 + $0x10] sm:$0xff] }
 0x668   :  { %4382 = vmatprep.mubr.msk.f32.mxu1 %vm4572_vm1, %v4571_v0 }
 0x705   :  { %v1545_v33 = vpop.f32.mrf.mxu1 }
 0x706   :  { %v1559_v34 = vadd.f32 %v1545_v33, %v1372_v15  ;;  %v3640_v33 = vld [vmem:[%s5521_s7 + $0x18] sm:$0xff] }
 0x707   :  { %v4292_v35 = vpop.f32.mrf.mxu1 }
 0x709   :  { %v1550_v36 = vpop.f32.mrf.mxu1 }
 0x70a   :  { %v1560_v37 = vadd.f32 %v1550_v36, %v1373_v18 }
 0x70b   :  { %v4295_v38 = vpop.f32.mrf.mxu1 }
 0x70d   :  { %v1555_v39 = vpop.f32.mrf.mxu1 }
 0x70e   :  { %v1561_v40 = vadd.f32 %v1555_v39, %v1374_v21  ;;  %v3632_v21 = vld [vmem:[%s5520_s6 + $0x4] sm:$0x3] }
 0x70f   :  { %v4298_v41 = vpop.f32.mrf.mxu1 }
 0x71f   :  { %v1641_v42 = vpop.f32.mrf.mxu1 }
 0x720   :  { %4337 = vmatmul.mubr.msk.f32.vlgmr.msra.gmra.mxu0 %vm448_vm5, %v1641_v42 }
 0x721   :  { %4346 = vmatpush3.msk.msra.mxu0 %vm268_vm3, %v4750_v55  ;;  %v4327_v43 = vpop.f32.mrf.mxu1  ;;  %4339 = vmatprep.mubr.msk.f32.mxu0 %vm4572_vm1, %v4571_v0 }
 0x722   :  { %4347 = vmatprep.subr.mxu0 %v4571_v0 }
 0x723   :  { %4348 = vmatpush3.msra.mxu0 %v4754_v57  ;;  %v1646_v44 = vpop.f32.mrf.mxu1 }
 0x724   :  { %4349 = vmatprep.subr.mxu0 %v4571_v0  ;;  %4340 = vmatmul.mubr.msk.f32.gmra.mxu0 %vm448_vm5, %v1646_v44  ;;  %v3642_v44 = vld [vmem:[%s5520_s6 + $0x8] sm:$0x3] }
 0x725   :  { %4350 = vmatpush3.msra.mxu0 %v4758_v59  ;;  %v4330_v45 = vpop.f32.mrf.mxu1  ;;  %4342 = vmatprep.mubr.msk.f32.mxu0 %vm4572_vm1, %v4571_v0  ;;  %v3612_v59 = vld [vmem:[%s5518_s3 + $0xc0] sm:$0xff] }
 0x726   :  { %4351 = vmatprep.subr.mxu0 %v4571_v0  ;;  %v3645_v45 = vld [vmem:[%s5521_s7 + $0x20] sm:$0xff] }
 0x727   :  { %4352 = vmatpush3.msra.mxu0 %v4762_v61  ;;  %v1651_v55 = vpop.f32.mrf.mxu1  ;;  %v3613_v61 = vld [vmem:[%s5518_s3 + $0xc8] sm:$0xff] }
 0x728   :  { %4353 = vmatprep.subr.mxu0 %v4571_v0  ;;  %4343 = vmatmul.mubr.msk.f32.gmra.mxu0 %vm448_vm5, %v1651_v55 }
 0x729   :  { %4354 = vmatpush3.msra.mxu0 %v4766_v63  ;;  %v4333_v57 = vpop.f32.mrf.mxu1  ;;  %4371 = vmatprep.mubr.msk.f32.mxu0 %vm4572_vm1, %v4571_v0  ;;  %v3614_v63 = vld [vmem:[%s5518_s3 + $0xd0] sm:$0x3] }
 0x72a   :  { %4355 = vmatprep.subr.mxu0 %v4571_v0 }
 0x72b   :  { %4356 = vmatpush3.msra.mxu0 %v4770_v1  ;;  %v3619_v1 = vld [vmem:[%s5516_s4 + $0x40] sm:$0xff] }
 0x72c   :  { %4357 = vmatprep.subr.mxu0 %v4571_v0  ;;  %4381 = vmatpush3.msra.mxu1 %v3619_v1  ;;  %v3647_v1 = vld [vmem:[%s5520_s6 + $0xa] sm:$0x3] }
 0x72d   :  { %4358 = vmatpush3.msra.mxu0 %v4774_v2  ;;  %4391 = vmatprep.subr.mxu1 %v4571_v0 }
 0x72e   :  { %4359 = vmatprep.subr.mxu0 %v4571_v0 }
 0x72f   :  { %4360 = vmatpush3.msra.mxu0 %v4778_v3 }
 0x730   :  { %4361 = vmatprep.subr.mxu0 %v4571_v0 }
 0x731   :  { %4362 = vmatpush3.msra.mxu0 %v4782_v4 }
 0x732   :  { %4363 = vmatprep.subr.mxu0 %v4571_v0 }
 0x733   :  { %4364 = vmatpush3.msra.mxu0 %v4786_v5 }
 0x734   :  { %4365 = vmatprep.subr.mxu0 %v4571_v0 }
 0x735   :  { %4366 = vmatpush3.msra.mxu0 %v4790_v6 }
 0x736   :  { %4367 = vmatprep.subr.mxu0 %v4571_v0 }
 0x737   :  { %4368 = vmatpush3.msra.mxu0 %v4794_v7 }
 0x738   :  { %4369 = vmatprep.subr.mxu0 %v4571_v0 }
 0x739   :  { %4370 = vmatpush3.msra.mxu0 %v4801_v9 }
 0x73a   :  { %4372 = vmatmul.mubr.msk.f32.vlgmr.msra.gmra.mxu0 %vm258_vm4, %v3612_v59  ;;  %4419 = vmatprep.subr.mxu0 %v4571_v0 }
 0x73b   :  { %4374 = vmatprep.mubr.msk.f32.mxu0 %vm4572_vm1, %v4571_v0 }
 0x73e   :  { %4375 = vmatmul.mubr.msk.f32.gmra.mxu0 %vm258_vm4, %v3613_v61 }
 0x73f   :  { %4377 = vmatprep.mubr.msk.f32.mxu0 %vm4572_vm1, %v4571_v0 }
 0x742   :  { %4378 = vmatmul.mubr.msk.f32.gmra.mxu0 %vm258_vm4, %v3614_v63 }
 0x743   :  { %4425 = vmatprep.mubr.msk.f32.mxu0 %vm4572_vm1, %v4571_v0 }
 0x7e0   :  { %v1732_v2 = vpop.f32.mrf.mxu0 }
 0x7e1   :  { %v1746_v3 = vadd.f32 %v1732_v2, %v1559_v34  ;;  %v3650_v2 = vld [vmem:[%s5521_s7 + $0x28] sm:$0xff] }
 0x7e2   :  { %v4338_v4 = vpop.f32.mrf.mxu0 }
 0x7e4   :  { %v1737_v5 = vpop.f32.mrf.mxu0 }
 0x7e5   :  { %v1747_v6 = vadd.f32 %v1737_v5, %v1560_v37 }
 0x7e6   :  { %v4341_v7 = vpop.f32.mrf.mxu0 }
 0x7e8   :  { %v1742_v9 = vpop.f32.mrf.mxu0 }
 0x7e9   :  { %v1748_v46 = vadd.f32 %v1742_v9, %v1561_v40  ;;  %v3652_v9 = vld [vmem:[%s5520_s6 + $0xc] sm:$0x3] }
 0x7ea   :  { %v4344_v47 = vpop.f32.mrf.mxu0 }
 0x7fa   :  { %v1828_v48 = vpop.f32.mrf.mxu0 }
 0x7fb   :  { %4383 = vmatmul.mubr.msk.f32.vlgmr.msra.gmra.mxu1 %vm448_vm5, %v1828_v48 }
 0x7fc   :  { %v4373_v49 = vpop.f32.mrf.mxu0  ;;  %4385 = vmatprep.mubr.msk.f32.mxu1 %vm4572_vm1, %v4571_v0 }
 0x7fe   :  { %v1833_v50 = vpop.f32.mrf.mxu0 }
 0x7ff   :  { %4386 = vmatmul.mubr.msk.f32.gmra.mxu1 %vm448_vm5, %v1833_v50 }
 0x800   :  { %v4376_v51 = vpop.f32.mrf.mxu0  ;;  %4388 = vmatprep.mubr.msk.f32.mxu1 %vm4572_vm1, %v4571_v0 }
 0x802   :  { %v1838_v52 = vpop.f32.mrf.mxu0 }
 0x803   :  { %4389 = vmatmul.mubr.msk.f32.gmra.mxu1 %vm448_vm5, %v1838_v52  ;;  %v3657_v52 = vld [vmem:[%s5520_s6 + $0xe] sm:$0x3] }
 0x804   :  { %v4379_v53 = vpop.f32.mrf.mxu0  ;;  %4397 = vmatprep.mubr.msk.f32.mxu1 %vm4572_vm1, %v4571_v0 }
 0x805   :  { %v3660_v53 = vld [vmem:[%s5521_s7 + $0x38] sm:$0xff] }
 0x8bb   :  { %v1919_v54 = vpop.f32.mrf.mxu1 }
 0x8bc   :  { %v1933_v10 = vadd.f32 %v1919_v54, %v1746_v3 }
 0x8bd   :  { %v4384_v56 = vpop.f32.mrf.mxu1 }
 0x8be   :  { %v1943_v16 = vadd.f32 %v3623_v12, %v1933_v10  ;;  %v3665_v10 = vld [vmem:[%s5521_s7 + $0x40] sm:$0xff] }
 0x8bf   :  { %v1924_v58 = vpop.f32.mrf.mxu1 }
 0x8c0   :  { %v1934_v62 = vadd.f32 %v1924_v58, %v1747_v6 }
 0x8c1   :  { %v4387_v60 = vpop.f32.mrf.mxu1 }
 0x8c2   :  { %v1944_v14 = vadd.f32 %v3623_v12, %v1934_v62 }
 0x8c3   :  { %v1929_v8 = vpop.f32.mrf.mxu1 }
 0x8c4   :  { %v1935_v11 = vadd.f32 %v1929_v8, %v1748_v46  ;;  %v3655_v46 = vld [vmem:[%s5521_s7 + $0x30] sm:$0xff] }
 0x8c5   :  { %v4390_v13 = vpop.f32.mrf.mxu1  ;;  %v3662_v8 = vld [vmem:[%s5520_s6 + $0x10] sm:$0x3] }
 0x8c6   :  { %v1945_v15 = vadd.f32 %v3623_v12, %v1935_v11 }
 0x8c8   :  { %4561 = vtanh.f32 %v1945_v15 }
 0x8c9   :  { %4563 = vtanh.f32 %v1944_v14 }
 0x8ca   :  { %4565 = vtanh.f32 %v1943_v16  ;;  %v3317_v16 = vld [vmem:[%s5522_s9] sm:$0xff] }
 0x8d5   :  { %v5297_v17 = vpop.eup %4561 }
 0x8d6   :  { %4392 = vmatpush3.msk.msra.mxu1 %vm268_vm3, %v5297_v17  ;;  %4420 = vmatpush3.msk.msra.mxu0 %vm268_vm3, %v5297_v17  ;;  %v5303_v18 = vpop.eup %4563 }
 0x8d7   :  { %4393 = vmatprep.subr.mxu1 %v4571_v0  ;;  %4421 = vmatprep.subr.mxu0 %v4571_v0  ;;  %v5312_v20 = vpop.eup %4565 }
 0x8d8   :  { %4394 = vmatpush3.msra.mxu1 %v5303_v18  ;;  %4422 = vmatpush3.msra.mxu0 %v5303_v18 }
 0x8d9   :  { %4395 = vmatprep.subr.mxu1 %v4571_v0  ;;  %4423 = vmatprep.subr.mxu0 %v4571_v0 }
 0x8da   :  { %4396 = vmatpush3.msra.mxu1 %v5312_v20  ;;  %4424 = vmatpush3.msra.mxu0 %v5312_v20 }
 0x8db   :  { %4400 = vmatprep.subr.mxu1 %v4571_v0  ;;  %4398 = vmatmul.mubr.msk.f32.vlgmr.msra.gmra.mxu1 %vm1950_vm6, %v1949_v19 }
 0x8dc   :  { %4401 = vmatpush3.msk.msra.mxu1 %vm268_vm3, %v5297_v17  ;;  %4406 = vmatprep.mubr.msk.f32.mxu1 %vm4572_vm1, %v4571_v0 }
 0x8dd   :  { %4402 = vmatprep.subr.mxu1 %v4571_v0  ;;  %4426 = vmatmul.mubr.msk.f32.vlgmr.msra.gmra.mxu0 %vm1950_vm6, %v3632_v21 }
 0x8de   :  { %4403 = vmatpush3.msra.mxu1 %v5303_v18  ;;  %4442 = vmatprep.subr.mxu0 %v4571_v0 }
 0x8df   :  { %4404 = vmatprep.subr.mxu1 %v4571_v0  ;;  %4444 = vmatprep.mubr.msk.f32.mxu0 %vm4572_vm1, %v4571_v0 }
 0x8e0   :  { %4405 = vmatpush3.msra.mxu1 %v5312_v20  ;;  %4443 = vmatpush3.msra.mxu0 %v3640_v33 }
 0x8e1   :  { %4407 = vmatmul.mubr.msk.f32.vlgmr.msra.gmra.mxu1 %vm1950_vm6, %v3626_v22  ;;  %4409 = vmatprep.subr.mxu1 %v4571_v0 }
 0x8e2   :  { %4411 = vmatprep.mubr.msk.f32.mxu1 %vm4572_vm1, %v4571_v0  ;;  %4410 = vmatpush3.msra.mxu1 %v3629_v23  ;;  %v3402_v23 = vld [vmem:[%s5524_s11 + $0x18] sm:$0xff] }
 0x8e3   :  { %4414 = vmatprep.subr.mxu1 %v4571_v0  ;;  %4447 = vmatprep.subr.mxu0 %v4571_v0 }
 0x99b   :  { %v2023_v24 = vpop.f32.mrf.mxu1 }
 0x99d   :  { %v4399_v25 = vpop.f32.mrf.mxu1  ;;  %v2322_v26 = vpop.f32.mrf.mxu0 }
 0x99e   :  { %v3400_v25 = vld [vmem:[%s5524_s11 + $0x8] sm:$0xff] }
 0x99f   :  { %v4427_v27 = vpop.f32.mrf.mxu0 }
 0x9a0   :  { %v3668_v27 = vld [vmem:[%s5525_s10] ss:$0 sm:$0xff] }
 0x9a1   :  { %v2099_v29 = vpop.f32.mrf.mxu1 }
 0x9a2   :  { %4412 = vmatmul.mubr.msk.f32.vlgmr.msra.gmra.mxu1 %vm448_vm5, %v2099_v29 }
 0x9a3   :  { %4415 = vmatpush3.msra.mxu1 %v2027_v28  ;;  %4416 = vmatprep.mubr.msk.f32.mxu1 %vm4572_vm1, %v4571_v0  ;;  %v4408_v30 = vpop.f32.mrf.mxu1 }
 0x9a4   :  { %4428 = vmatprep.subr.mxu1 %v4571_v0 }
 0x9a6   :  { %4417 = vmatmul.mubr.msk.f32.vlgmr.msra.gmra.mxu1 %vm448_vm5, %v2023_v24  ;;  %v3401_v24 = vld [vmem:[%s5524_s11 + $0x10] sm:$0xff] }
 0x9a7   :  { %4429 = vmatpush3.msra.mxu1 %v3635_v31  ;;  %4430 = vmatprep.mubr.msk.f32.mxu1 %vm4572_vm1, %v4571_v0 }
 0x9a8   :  { %4433 = vmatprep.subr.mxu1 %v4571_v0 }
 0x9aa   :  { %4431 = vmatmul.mubr.msk.f32.vlgmr.msra.gmra.mxu1 %vm448_vm5, %v2322_v26  ;;  %v3399_v26 = vld [vmem:[%s5524_s11] sm:$0xff] }
 0x9ab   :  { %4434 = vmatpush3.msk.msra.mxu1 %vm268_vm3, %v5297_v17  ;;  %4439 = vmatprep.mubr.msk.f32.mxu1 %vm4572_vm1, %v4571_v0 }
 0x9ac   :  { %4435 = vmatprep.subr.mxu1 %v4571_v0 }
 0x9ad   :  { %4436 = vmatpush3.msra.mxu1 %v5303_v18 }
 0x9ae   :  { %4437 = vmatprep.subr.mxu1 %v4571_v0 }
 0x9af   :  { %4438 = vmatpush3.msra.mxu1 %v5312_v20 }
 0x9b0   :  { %4440 = vmatmul.mubr.msk.f32.vlgmr.msra.gmra.mxu1 %vm1950_vm6, %v3637_v32  ;;  %4456 = vmatprep.subr.mxu1 %v4571_v0  ;;  %v3670_v32 = vld [vmem:[%s5526_s12] ss:$0 sm:$0xff] }
 0x9b1   :  { %4458 = vmatprep.mubr.msk.f32.mxu1 %vm4572_vm1, %v4571_v0  ;;  %4457 = vmatpush3.msra.mxu1 %v3645_v45 }
 0x9b2   :  { %4461 = vmatprep.subr.mxu1 %v4571_v0 }
 0xa62   :  { %v2174_v34 = vpop.f32.mrf.mxu1 }
 0xa64   :  { %v4413_v35 = vpop.f32.mrf.mxu1 }
 0xa66   :  { %v2247_v36 = vpop.f32.mrf.mxu1 }
 0xa67   :  { %v2248_v37 = vadd.f32 %v2247_v36, %v2174_v34  ;;  %v3484_v36 = vlaneseq }
 0xa68   :  { %v4418_v38 = vpop.f32.mrf.mxu1 }
 0xa6a   :  { %v2397_v39 = vpop.f32.mrf.mxu1 }
 0xa6b   :  { %v2401_v40 = vadd.f32 %v2397_v39, %v2248_v37  ;;  %v3485_v37 = vand.u32 127, %v3484_v36 }
 0xa6c   :  { %v4432_v41 = vpop.f32.mrf.mxu1 }
 0xa70   :  { %v2473_v42 = vpop.f32.mrf.mxu1 }
 0xa71   :  { %4445 = vmatmul.mubr.msk.f32.vlgmr.msra.gmra.mxu0 %vm448_vm5, %v2473_v42 }
 0xa72   :  { %4448 = vmatpush3.msk.msra.mxu0 %vm268_vm3, %v5297_v17  ;;  %4453 = vmatprep.mubr.msk.f32.mxu0 %vm4572_vm1, %v4571_v0  ;;  %v4441_v43 = vpop.f32.mrf.mxu1 }
 0xa73   :  { %4449 = vmatprep.subr.mxu0 %v4571_v0 }
 0xa74   :  { %4450 = vmatpush3.msra.mxu0 %v5303_v18 }
 0xa75   :  { %4451 = vmatprep.subr.mxu0 %v4571_v0 }
 0xa76   :  { %4452 = vmatpush3.msra.mxu0 %v5312_v20 }
 0xa77   :  { %4454 = vmatmul.mubr.msk.f32.vlgmr.msra.gmra.mxu0 %vm1950_vm6, %v3642_v44  ;;  %4470 = vmatprep.subr.mxu0 %v4571_v0 }
 0xa78   :  { %4472 = vmatprep.mubr.msk.f32.mxu0 %vm4572_vm1, %v4571_v0  ;;  %4471 = vmatpush3.msra.mxu0 %v3650_v2 }
 0xa79   :  { %4475 = vmatprep.subr.mxu0 %v4571_v0 }
 0xb31   :  { %v2548_v55 = vpop.f32.mrf.mxu0 }
 0xb32   :  { %v2552_v57 = vadd.f32 %v2548_v55, %v2401_v40 }
 0xb33   :  { %v4446_v59 = vpop.f32.mrf.mxu0 }
 0xb37   :  { %v2624_v61 = vpop.f32.mrf.mxu0 }
 0xb38   :  { %4459 = vmatmul.mubr.msk.f32.vlgmr.msra.gmra.mxu1 %vm448_vm5, %v2624_v61 }
 0xb39   :  { %4462 = vmatpush3.msk.msra.mxu1 %vm268_vm3, %v5297_v17  ;;  %4467 = vmatprep.mubr.msk.f32.mxu1 %vm4572_vm1, %v4571_v0  ;;  %v4455_v63 = vpop.f32.mrf.mxu0 }
 0xb3a   :  { %4463 = vmatprep.subr.mxu1 %v4571_v0 }
 0xb3b   :  { %4464 = vmatpush3.msra.mxu1 %v5303_v18 }
 0xb3c   :  { %4465 = vmatprep.subr.mxu1 %v4571_v0 }
 0xb3d   :  { %4466 = vmatpush3.msra.mxu1 %v5312_v20 }
 0xb3e   :  { %4468 = vmatmul.mubr.msk.f32.vlgmr.msra.gmra.mxu1 %vm1950_vm6, %v3647_v1  ;;  %4484 = vmatprep.subr.mxu1 %v4571_v0 }
 0xb3f   :  { %4486 = vmatprep.mubr.msk.f32.mxu1 %vm4572_vm1, %v4571_v0  ;;  %4485 = vmatpush3.msra.mxu1 %v3655_v46 }
 0xb40   :  { %4489 = vmatprep.subr.mxu1 %v4571_v0 }
 0xbf8   :  { %v2699_v3 = vpop.f32.mrf.mxu1 }
 0xbf9   :  { %v2703_v4 = vadd.f32 %v2699_v3, %v2552_v57 }
 0xbfa   :  { %v4460_v5 = vpop.f32.mrf.mxu1 }
 0xbfe   :  { %v2775_v6 = vpop.f32.mrf.mxu1 }
 0xbff   :  { %4473 = vmatmul.mubr.msk.f32.vlgmr.msra.gmra.mxu0 %vm448_vm5, %v2775_v6 }
 0xc00   :  { %4476 = vmatpush3.msk.msra.mxu0 %vm268_vm3, %v5297_v17  ;;  %4481 = vmatprep.mubr.msk.f32.mxu0 %vm4572_vm1, %v4571_v0  ;;  %v4469_v7 = vpop.f32.mrf.mxu1 }
 0xc01   :  { %4477 = vmatprep.subr.mxu0 %v4571_v0 }
 0xc02   :  { %4478 = vmatpush3.msra.mxu0 %v5303_v18 }
 0xc03   :  { %4479 = vmatprep.subr.mxu0 %v4571_v0 }
 0xc04   :  { %4480 = vmatpush3.msra.mxu0 %v5312_v20 }
 0xc05   :  { %4482 = vmatmul.mubr.msk.f32.vlgmr.msra.gmra.mxu0 %vm1950_vm6, %v3652_v9  ;;  %4498 = vmatprep.subr.mxu0 %v4571_v0 }
 0xc06   :  { %4500 = vmatprep.mubr.msk.f32.mxu0 %vm4572_vm1, %v4571_v0  ;;  %4499 = vmatpush3.msra.mxu0 %v3660_v53 }
 0xc07   :  { %4503 = vmatprep.subr.mxu0 %v4571_v0 }
 0xcbf   :  { %v2850_v47 = vpop.f32.mrf.mxu0 }
 0xcc0   :  { %v2854_v48 = vadd.f32 %v2850_v47, %v2703_v4 }
 0xcc1   :  { %v4474_v49 = vpop.f32.mrf.mxu0 }
 0xcc5   :  { %v2926_v50 = vpop.f32.mrf.mxu0 }
 0xcc6   :  { %4487 = vmatmul.mubr.msk.f32.vlgmr.msra.gmra.mxu1 %vm448_vm5, %v2926_v50 }
 0xcc7   :  { %4490 = vmatpush3.msk.msra.mxu1 %vm268_vm3, %v5297_v17  ;;  %4495 = vmatprep.mubr.msk.f32.mxu1 %vm4572_vm1, %v4571_v0  ;;  %v4483_v51 = vpop.f32.mrf.mxu0 }
 0xcc8   :  { %4491 = vmatprep.subr.mxu1 %v4571_v0 }
 0xcc9   :  { %4492 = vmatpush3.msra.mxu1 %v5303_v18 }
 0xcca   :  { %4493 = vmatprep.subr.mxu1 %v4571_v0 }
 0xccb   :  { %4494 = vmatpush3.msra.mxu1 %v5312_v20 }
 0xccc   :  { %4496 = vmatmul.mubr.msk.f32.vlgmr.msra.gmra.mxu1 %vm1950_vm6, %v3657_v52  ;;  %4512 = vmatprep.subr.mxu1 %v4571_v0 }
 0xccd   :  { %4514 = vmatprep.mubr.msk.f32.mxu1 %vm4572_vm1, %v4571_v0  ;;  %4513 = vmatpush3.msra.mxu1 %v3665_v10 }
 0xcce   :  { %4517 = vmatprep.subr.mxu1 %v4571_v0 }
 0xd86   :  { %v3001_v54 = vpop.f32.mrf.mxu1 }
 0xd87   :  { %v3005_v56 = vadd.f32 %v3001_v54, %v2854_v48 }
 0xd88   :  { %v4488_v58 = vpop.f32.mrf.mxu1 }
 0xd8c   :  { %v3077_v60 = vpop.f32.mrf.mxu1 }
 0xd8d   :  { %4501 = vmatmul.mubr.msk.f32.vlgmr.msra.gmra.mxu0 %vm448_vm5, %v3077_v60 }
 0xd8e   :  { %4504 = vmatpush3.msk.msra.mxu0 %vm268_vm3, %v5297_v17  ;;  %4509 = vmatprep.mubr.msk.f32.mxu0 %vm4572_vm1, %v4571_v0  ;;  %v4497_v62 = vpop.f32.mrf.mxu1 }
 0xd8f   :  { %4505 = vmatprep.subr.mxu0 %v4571_v0 }
 0xd90   :  { %4506 = vmatpush3.msra.mxu0 %v5303_v18  ;;  %v3667_v18 = vld [vmem:[%s5523_s8] ss:$0 sm:$0xff] }
 0xd91   :  { %4507 = vmatprep.subr.mxu0 %v4571_v0 }
 0xd92   :  { %4508 = vmatpush3.msra.mxu0 %v5312_v20 }
 0xd93   :  { %4510 = vmatmul.mubr.msk.f32.vlgmr.msra.gmra.mxu0 %vm1950_vm6, %v3662_v8  ;;  %4522 = vmatprep.subr.mxu0 %v4571_v0 }
 0xd94   :  { %4530 = vmatprep.mubr.msk.f32.mxu0 %vm4572_vm1, %v4571_v0  ;;  %4523 = vmatpush3.msra.mxu0 %v3402_v23 }
 0xd95   :  { %4524 = vmatprep.subr.mxu0 %v4571_v0 }
 0xd96   :  { %4525 = vmatpush3.msra.mxu0 %v3401_v24 }
 0xd97   :  { %4526 = vmatprep.subr.mxu0 %v4571_v0 }
 0xd98   :  { %4527 = vmatpush3.msra.mxu0 %v3400_v25 }
 0xd99   :  { %4528 = vmatprep.subr.mxu0 %v4571_v0 }
 0xd9a   :  { %4529 = vmatpush3.msra.mxu0 %v3399_v26 }
 0xe4d   :  { %v3152_v11 = vpop.f32.mrf.mxu0 }
 0xe4e   :  { %v3156_v12 = vadd.f32 %v3152_v11, %v3005_v56 }
 0xe4f   :  { %v4502_v13 = vpop.f32.mrf.mxu0 }
 0xe53   :  { %v3228_v14 = vpop.f32.mrf.mxu0 }
 0xe54   :  { %4515 = vmatmul.mubr.msk.f32.vlgmr.msra.gmra.mxu1 %vm448_vm5, %v3228_v14 }
 0xe55   :  { %v4511_v15 = vpop.f32.mrf.mxu0  ;;  %4519 = vmatprep.mubr.msk.f32.mxu1 %vm4572_vm1, %v4571_v0  ;;  %4518 = vmatpush3.msra.mxu1 %v3317_v16 }
 0xf14   :  { %v3303_v17 = vpop.f32.mrf.mxu1 }
 0xf15   :  { %v3307_v19 = vadd.f32 %v3303_v17, %v3156_v12 }
 0xf16   :  { %v4516_v20 = vpop.f32.mrf.mxu1 }
 0xf17   :  { %v3315_v21 = vadd.f32 %v3667_v18, %v3307_v19 }
 0xf19   :  { %4567 = vtanh.f32 %v3315_v21 }
 0xf26   :  { %v4568_v22 = vpop.eup %4567 }
 0xf27   :  { %4520 = vmatmul.mubr.msk.f32.vlgmr.msra.gmra.mxu1 %vm448_vm5, %v4568_v22 }
 0xfe7   :  { %v3394_v28 = vpop.f32.mrf.mxu1 }
 0xfe8   :  { %v3395_v29 = vadd.f32 %v3668_v27, %v3394_v28 }
 0xfe9   :  { %v4521_v30 = vpop.f32.mrf.mxu1 }
 0xfea   :  { %4569 = vtanh.f32 %v3395_v29 }
 0xff7   :  { %v4570_v31 = vpop.eup %4569 }
 0xff8   :  { %4531 = vmatmul.mubr.msk.f32.vlgmr.msra.gmra.mxu0 %vm3410_vm7, %v4570_v31 }
0x10b8   :  { %v3480_v33 = vpop.f32.mrf.mxu0 }
0x10b9   :  { %v3481_v34 = vadd.f32 %v3670_v32, %v3480_v33 }
0x10ba   :  { %v4532_v0 = vpop.f32.mrf.mxu0 }
0x10bb   :  { %v3487_v35 = vsel %vm3486_vm8, %v3481_v34, -inf }
0x10bc   :  { %3488 = vmax.xlane.f32.xlu0 %v3487_v35 }
0x1145   :  { %v3489_v38 = vpop.xlane.xlu0 %3488 }
0x1146   :  { %vm3490_vm9 = vcmp.eq.f32.partialorder %v3481_v34, %v3489_v38 }
0x1147   :  { %v3491_v39 = vsel %vm3490_vm9, %v3485_v37, 4 }
0x1148   :  { %v3492_v40 = vsel %vm3486_vm8, %v3491_v39, 2147483647 }
0x1149   :  { %v3494_v41 = vshra.s32 %v3492_v40, 16  ;;  %v3493_v43 = vand.u32 65535, %v3492_v40 }
0x114b   :  { %v3496_v42 = vcvt.s32.f32 %v3494_v41  ;;  %v3495_v45 = vcvt.s32.f32 %v3493_v43 }
0x114d   :  { %3497 = vmin.xlane.f32.xlu0 %v3496_v42 }
0x11d6   :  { %v3498_v44 = vpop.xlane.xlu0 %3497 }
0x11d7   :  { %vm3499_vm10 = vcmp.eq.f32.partialorder %v3496_v42, %v3498_v44  ;;  %v3504_v57 = vcvt.f32.s32 %v3498_v44 }
0x11d8   :  { %v3500_v55 = vsel %vm3499_vm10, %v3495_v45, inf }
0x11d9   :  { %3501 = vmin.xlane.f32.xlu1 %v3500_v55  ;;  %v3505_v61 = vshll.u32 %v3504_v57, 16 }
0x1262   :  { %v3502_v59 = vpop.xlane.xlu1 %3501 }
0x1263   :  { %v3503_v63 = vcvt.f32.s32 %v3502_v59 }
0x1265   :  { %v3506_v1 = vadd.s32 %v3505_v61, %v3503_v63 }
0x1267   :  { %3508 = vst.msk [vmem:[%s5527_s13] sm:$0x3] %vm3507_vm11, %v3506_v1 }

</bundles_post_ra>
